<compile_context>
chip_gen: v5e
topology: v5e:2x2
jax: 0.10.0
libtpu: 0.0.40
codegen_flags: <defaults>
</compile_context>

<pallas_src>
import functools
import math

import jax
import jax.numpy as jnp
from jax.experimental import pallas as pl
from jax.experimental.pallas import tpu as pltpu


# ----------------------------- in-kernel helpers -----------------------------

def _layernorm(x, w, b, eps=1e-5):
    # x (T, C) f32; w, b (1, C) f32.  Matches torch.nn.LayerNorm (biased var).
    mu = jnp.mean(x, axis=-1, keepdims=True)
    xc = x - mu
    var = jnp.mean(xc * xc, axis=-1, keepdims=True)
    return xc * jax.lax.rsqrt(var + eps) * w + b


def _gelu_tanh(x):
    # GELU(approximate='tanh'), f32 math (v5e-safe).
    c = math.sqrt(2.0 / math.pi)
    return 0.5 * x * (1.0 + jnp.tanh(c * (x + 0.044715 * x * x * x)))


# ------------------------------- fused Encoder kernel -------------------------------

def encoder_kernel(x_ref, wqkv_ref, bqkv_ref, wo_ref, wfc_ref, wmlp_ref, slab_ref,
                   o_ref, k_scr, v_scr, *, n_head, hd_pad, tile):
    """grid = (B, n_layer).  One transformer Block per invocation; the f32
    residual is resident in o_ref across the layer axis; final LN fused into
    the last layer."""
    bf16 = jnp.bfloat16
    layer = pl.program_id(1)
    n_layer = pl.num_programs(1)

    T, C = x_ref.shape[1], x_ref.shape[2]
    H, hdp = n_head, hd_pad
    Hhdp = H * hdp

    # Initialize the resident residual from the embeddings on the first layer.
    @pl.when(layer == 0)
    def _init():
        o_ref[...] = x_ref[...].astype(o_ref.dtype)

    x = o_ref[0]                                   # (T, C) f32 residual stream

    # Small f32 params packed in one slab: rows
    # 0 ln1w | 1 ln1b | 2 ln2w | 3 ln2b | 4 bo | 5 bmlp | 6 bfc(4C) | 7 lnfw | 8 lnfb
    slab = slab_ref[0]                             # (16, 4C) f32
    ln1w, ln1b = slab[0:1, 0:C], slab[1:2, 0:C]
    ln2w, ln2b = slab[2:3, 0:C], slab[3:4, 0:C]
    bo, bmlp = slab[4:5, 0:C], slab[5:6, 0:C]
    bfc = slab[6:7, :]
    lnfw, lnfb = slab[7:8, 0:C], slab[8:9, 0:C]

    # ---------------- causal self-attention branch ----------------
    h1 = _layernorm(x, ln1w, ln1b)                                 # (T, C) f32
    # One fused lane-dense QKV matmul (scale already folded into Q weight/bias).
    qkv = (jnp.dot(h1.astype(bf16), wqkv_ref[0],
                   preferred_element_type=jnp.float32)
           + bqkv_ref[0]).astype(bf16)                             # (T, 3*H*hdp)

    qf = qkv[:, 0 * Hhdp:1 * Hhdp]
    kf = qkv[:, 1 * Hhdp:2 * Hhdp]
    vf = qkv[:, 2 * Hhdp:3 * Hhdp]
    # Per-head views via tile-aligned lane slices (hdp is a multiple of 128).
    q = jnp.stack([qf[:, h * hdp:(h + 1) * hdp] for h in range(H)], axis=0)
    k_scr[...] = jnp.stack([kf[:, h * hdp:(h + 1) * hdp] for h in range(H)], axis=0)
    v_scr[...] = jnp.stack([vf[:, h * hdp:(h + 1) * hdp] for h in range(H)], axis=0)

    num_t = T // tile
    y_blocks = []
    for qi in range(num_t):                        # static loop over query tiles
        qb = q[:, qi * tile:(qi + 1) * tile, :]    # (H, tile, hdp) bf16
        row = qi * tile + jax.lax.broadcasted_iota(jnp.int32, (tile, tile), 0)

        def kv_step(j, carry, _row=row, _qb=qb):
            m_i, l_i, acc = carry
            start = j * tile
            if not isinstance(start, int):
                start = pl.multiple_of(start, tile)
            kj = k_scr[:, pl.ds(start, tile), :]                   # (H, tile, hdp)
            vj = v_scr[:, pl.ds(start, tile), :]
            s = jnp.einsum('htd,hsd->hts', _qb, kj,
                           preferred_element_type=jnp.float32)     # (H, tile, tile)
            col = j * tile + jax.lax.broadcasted_iota(jnp.int32, (tile, tile), 1)
            s = jnp.where((_row >= col)[None], s, -1e30)           # causal mask
            m_new = jnp.maximum(m_i, jnp.max(s, axis=-1, keepdims=True))
            alpha = jnp.exp(m_i - m_new)
            p = jnp.exp(s - m_new)
            l_new = alpha * l_i + jnp.sum(p, axis=-1, keepdims=True)
            acc_new = alpha * acc + jnp.einsum('hts,hsd->htd', p.astype(bf16), vj,
                                               preferred_element_type=jnp.float32)
            return m_new, l_new, acc_new

        m0 = jnp.full((H, tile, 1), -1e30, jnp.float32)
        l0 = jnp.zeros((H, tile, 1), jnp.float32)
        a0 = jnp.zeros((H, tile, hdp), jnp.float32)
        n_kv = qi + 1                              # block-causal: skip tiles past the diagonal
        if n_kv <= 4:                              # short -> unrolled for the LLO scheduler
            carry = (m0, l0, a0)
            for j in range(n_kv):
                carry = kv_step(j, carry)
            m_i, l_i, acc = carry
        else:                                      # long -> compact fori body, bounded live ranges
            m_i, l_i, acc = jax.lax.fori_loop(0, n_kv, kv_step, (m0, l0, a0))

        y_blocks.append(acc * pl.reciprocal(l_i, approx=True))     # (H, tile, hdp) f32

    y = y_blocks[0] if num_t == 1 else jnp.concatenate(y_blocks, axis=1)  # (H, T, hdp)
    # Output projection: sum_h (y_h @ Wproj_h) == concat(y_h) @ Wproj.
    yproj = jnp.einsum('htd,hdc->htc', y.astype(bf16), wo_ref[0],
                       preferred_element_type=jnp.float32)          # (H, T, C)
    x = x + (jnp.sum(yproj, axis=0) + bo)

    # ---------------------------- MLP branch ----------------------------
    h2 = _layernorm(x, ln2w, ln2b)
    f = jnp.dot(h2.astype(bf16), wfc_ref[0],
                preferred_element_type=jnp.float32) + bfc
    f = _gelu_tanh(f)
    m = jnp.dot(f.astype(bf16), wmlp_ref[0],
                preferred_element_type=jnp.float32) + bmlp
    x = x + m

    # Residual stays resident (f32); fuse the final LayerNorm into the last layer.
    o_ref[0] = x.astype(o_ref.dtype)

    @pl.when(layer == n_layer - 1)
    def _final():
        o_ref[0] = _layernorm(x, lnfw, lnfb).astype(o_ref.dtype)


# ------------------------------ pallas_call wrapper ------------------------------

def _pick_tile(T, cap=256):
    """Largest divisor of T <= cap (prefer multiples of 8).  Never falls back to T>cap."""
    cap = min(cap, T)
    divisors = [d for d in range(1, cap + 1) if T % d == 0]
    mult8 = [d for d in divisors if d % 8 == 0]
    return max(mult8) if mult8 else max(divisors)


def run_encoder(x, kp, *, n_head):
    B, T, C = x.shape
    L = kp["n_layer"]
    hdp = kp["hd_pad"]
    tile = _pick_tile(T, 256)

    kernel = functools.partial(encoder_kernel, n_head=n_head, hd_pad=hdp, tile=tile)
    # NOTE(perf): for small C (<128) the (1, T, C) I/O block stores are lane-sparse
    # masked vst's; real configs (C % 128 == 0) are lane-dense.  Left as-is here.
    in_specs = [
        pl.BlockSpec((1, T, C), lambda b, l: (b, 0, 0)),                       # x (fetched once per b)
        pl.BlockSpec((1,) + kp["wqkv"].shape[1:], lambda b, l: (l, 0, 0)),     # (1, C, 3*H*hdp)
        pl.BlockSpec((1,) + kp["bqkv"].shape[1:], lambda b, l: (l, 0, 0)),     # (1, 1, 3*H*hdp)
        pl.BlockSpec((1,) + kp["wo"].shape[1:],   lambda b, l: (l, 0, 0, 0)),  # (1, H, hdp, C)
        pl.BlockSpec((1,) + kp["wfc"].shape[1:],  lambda b, l: (l, 0, 0)),     # (1, C, 4C)
        pl.BlockSpec((1,) + kp["wmlp"].shape[1:], lambda b, l: (l, 0, 0)),     # (1, 4C, C)
        pl.BlockSpec((1,) + kp["slab"].shape[1:], lambda b, l: (l, 0, 0)),     # (1, 16, 4C)
    ]
    return pl.pallas_call(
        kernel,
        out_shape=jax.ShapeDtypeStruct((B, T, C), jnp.float32),
        grid=(B, L),                                   # layer axis last ("arbitrary", revisited output)
        in_specs=in_specs,
        out_specs=pl.BlockSpec((1, T, C), lambda b, l: (b, 0, 0)),
        scratch_shapes=[pltpu.VMEM((n_head, T, hdp), jnp.bfloat16),   # K
                        pltpu.VMEM((n_head, T, hdp), jnp.bfloat16)],  # V
        compiler_params=pltpu.CompilerParams(
            dimension_semantics=("parallel", "arbitrary"),
            vmem_limit_bytes=48 * 1024 * 1024),        # headroom vs v7x 64 MiB/TC
    )(x, kp["wqkv"], kp["bqkv"], kp["wo"], kp["wfc"], kp["wmlp"], kp["slab"])


# ------------------------------- parameter init --------------------------------

def init_params(key, vocab_size, block_size, n_embd, n_head, n_layer):
    """PyTorch-parity (f32, dense) parameters."""
    C = n_embd
    std = 0.02
    scaled_std = 0.02 * (2 * n_layer) ** (-0.5)        # NANOGPT_SCALE_INIT on c_proj

    keys = iter(jax.random.split(key, 2 + 4 * n_layer))
    params = {
        "wte": std * jax.random.normal(next(keys), (vocab_size, C), jnp.float32),
        "wpe": std * jax.random.normal(next(keys), (block_size, C), jnp.float32),
        "lnfw": jnp.ones((C,), jnp.float32),
        "lnfb": jnp.zeros((C,), jnp.float32),
        "blocks": [],
    }
    for _ in range(n_layer):
        blk = {
            "ln1w": jnp.ones((C,), jnp.float32),
            "ln1b": jnp.zeros((C,), jnp.float32),
            "wqkv": std * jax.random.normal(next(keys), (C, 3 * C), jnp.float32),
            "bqkv": jnp.zeros((3 * C,), jnp.float32),
            "wattnproj": scaled_std * jax.random.normal(next(keys), (C, C), jnp.float32),
            "battnproj": jnp.zeros((C,), jnp.float32),
            "ln2w": jnp.ones((C,), jnp.float32),
            "ln2b": jnp.zeros((C,), jnp.float32),
            "wfc": std * jax.random.normal(next(keys), (C, 4 * C), jnp.float32),
            "bfc": jnp.zeros((4 * C,), jnp.float32),
            "wmlpproj": scaled_std * jax.random.normal(next(keys), (4 * C, C), jnp.float32),
            "bmlpproj": jnp.zeros((C,), jnp.float32),
        }
        params["blocks"].append(blk)
    return params


def prepare_kernel_params(params, n_head):
    """Host-side reparametrization: stacked per-layer weights with a leading layer
    axis, fused + head-padded (hd -> multiple of 128) bf16 QKV / proj weights,
    1/sqrt(hd) folded into Q, and all tiny f32 params packed in one slab."""
    C = params["wte"].shape[1]
    H = n_head
    hd = C // H
    hdp = ((hd + 127) // 128) * 128                  # lane-dense padded head dim
    scale = 1.0 / math.sqrt(hd)
    bf16 = jnp.bfloat16
    SLAB_ROWS = 16

    def pad_cols(w):                                 # (C, C) -> (C, H*hdp)
        w = w.reshape(C, H, hd)
        w = jnp.pad(w, ((0, 0), (0, 0), (0, hdp - hd)))
        return w.reshape(C, H * hdp)

    def pad_bias(b):                                 # (C,) -> (H*hdp,)
        b = b.reshape(H, hd)
        b = jnp.pad(b, ((0, 0), (0, hdp - hd)))
        return b.reshape(H * hdp)

    wqkv_l, bqkv_l, wo_l, wfc_l, wmlp_l, slab_l = [], [], [], [], [], []
    for blk in params["blocks"]:
        wq = pad_cols(blk["wqkv"][:, 0:C]) * scale
        wk = pad_cols(blk["wqkv"][:, C:2 * C])
        wv = pad_cols(blk["wqkv"][:, 2 * C:3 * C])
        wqkv_l.append(jnp.concatenate([wq, wk, wv], axis=1).astype(bf16))   # (C, 3*H*hdp)

        bq = pad_bias(blk["bqkv"][0:C]) * scale
        bk = pad_bias(blk["bqkv"][C:2 * C])
        bv = pad_bias(blk["bqkv"][2 * C:3 * C])
        bqkv_l.append(jnp.concatenate([bq, bk, bv])[None, :])               # (1, 3*H*hdp) f32

        wo = blk["wattnproj"].reshape(H, hd, C)
        wo = jnp.pad(wo, ((0, 0), (0, hdp - hd), (0, 0)))
        wo_l.append(wo.astype(bf16))                                        # (H, hdp, C)

        wfc_l.append(blk["wfc"].astype(bf16))                               # (C, 4C)
        wmlp_l.append(blk["wmlpproj"].astype(bf16))                         # (4C, C)

        slab = jnp.zeros((SLAB_ROWS, 4 * C), jnp.float32)
        slab = slab.at[0, :C].set(blk["ln1w"])
        slab = slab.at[1, :C].set(blk["ln1b"])
        slab = slab.at[2, :C].set(blk["ln2w"])
        slab = slab.at[3, :C].set(blk["ln2b"])
        slab = slab.at[4, :C].set(blk["battnproj"])
        slab = slab.at[5, :C].set(blk["bmlpproj"])
        slab = slab.at[6, :].set(blk["bfc"])
        slab = slab.at[7, :C].set(params["lnfw"])    # final LN replicated per layer
        slab = slab.at[8, :C].set(params["lnfb"])
        slab_l.append(slab)

    return {
        "wte": params["wte"], "wpe": params["wpe"],
        "wqkv": jnp.stack(wqkv_l),    # (L, C, 3*H*hdp) bf16
        "bqkv": jnp.stack(bqkv_l),    # (L, 1, 3*H*hdp) f32
        "wo":   jnp.stack(wo_l),      # (L, H, hdp, C)  bf16
        "wfc":  jnp.stack(wfc_l),     # (L, C, 4C)      bf16
        "wmlp": jnp.stack(wmlp_l),    # (L, 4C, C)      bf16
        "slab": jnp.stack(slab_l),    # (L, 16, 4C)     f32
        "n_head": H, "hd_pad": hdp, "n_layer": len(params["blocks"]),
    }


# ------------------------------- Encoder forward --------------------------------

def encoder_forward(kp, idx, *, n_head, reverse_input):
    if reverse_input:
        idx = idx[:, ::-1]                            # idx.flip(1), plain JAX glue
    B, T = idx.shape
    tok_emb = kp["wte"][idx]                          # (B, T, C) gather, plain JAX glue
    pos_emb = kp["wpe"][:T]                           # (T, C)
    x = (tok_emb + pos_emb[None, :, :]).astype(jnp.float32)
    return run_encoder(x, kp, n_head=n_head)


# ------------------------------------ main ---------------------------------------

if __name__ == "__main__":
    # small config consistent with the module
    vocab_size = 64
    block_size = 16
    n_embd = 32
    n_head = 4
    n_layer = 2
    reverse_input = True

    B, T = 2, 8

    key = jax.random.PRNGKey(0)
    pkey, ikey = jax.random.split(key)
    params = init_params(pkey, vocab_size, block_size, n_embd, n_head, n_layer)
    kparams = prepare_kernel_params(params, n_head)
    idx = jax.random.randint(ikey, (B, T), 0, vocab_size, dtype=jnp.int32)

    out = encoder_forward(kparams, idx, n_head=n_head, reverse_input=reverse_input)
    out = jax.block_until_ready(out)
    assert out.shape == (B, T, n_embd)
    assert out.dtype == jnp.float32
    assert bool(jnp.all(jnp.isfinite(out)))
    print("KERNEL_OK")
</pallas_src>

<mosaic_0001>
module attributes {stable_mosaic.version = 11 : i64} {
  func.func @encoder_kernel(%arg0: i32, %arg1: i32, %arg2: memref<1x8x32xf32, #tpu.memory_space<vmem>>, %arg3: memref<1x32x1536xbf16, #tpu.memory_space<vmem>>, %arg4: memref<1x1x1536xf32, #tpu.memory_space<vmem>>, %arg5: memref<1x4x128x32xbf16, #tpu.memory_space<vmem>>, %arg6: memref<1x32x128xbf16, #tpu.memory_space<vmem>>, %arg7: memref<1x128x32xbf16, #tpu.memory_space<vmem>>, %arg8: memref<1x16x128xf32, #tpu.memory_space<vmem>>, %arg9: memref<1x8x32xf32, #tpu.memory_space<vmem>>, %arg10: memref<4x8x128xbf16, #tpu.memory_space<vmem>>, %arg11: memref<4x8x128xbf16, #tpu.memory_space<vmem>>) attributes {dimension_semantics = [#tpu.dimension_semantics<parallel>, #tpu.dimension_semantics<arbitrary>], iteration_bounds = array<i64: 2, 2>, scalar_prefetch = 0 : i64, scratch_operands = 2 : i64, tpu.core_type = #tpu.core_type<tc>, window_params = [{transform_indices = @transform_0, window_bounds = array<i64: 1, 8, 32>}, {transform_indices = @transform_1, window_bounds = array<i64: 1, 32, 1536>}, {transform_indices = @transform_2, window_bounds = array<i64: 1, 1, 1536>}, {transform_indices = @transform_3, window_bounds = array<i64: 1, 4, 128, 32>}, {transform_indices = @transform_4, window_bounds = array<i64: 1, 32, 128>}, {transform_indices = @transform_5, window_bounds = array<i64: 1, 128, 32>}, {transform_indices = @transform_6, window_bounds = array<i64: 1, 16, 128>}, {transform_indices = @transform_7, window_bounds = array<i64: 1, 8, 32>}]} {
    %c0_i32 = arith.constant 0 : i32
    %0 = arith.cmpi eq, %arg1, %c0_i32 : i32
    %1 = arith.extui %0 : i1 to i32
    %c0_i32_0 = arith.constant 0 : i32
    %2 = arith.cmpi ne, %1, %c0_i32_0 : i32
    scf.if %2 {
      %c0_66 = arith.constant 0 : index
      %c0_67 = arith.constant 0 : index
      %c0_68 = arith.constant 0 : index
      %175 = vector.load %arg2[%c0_66, %c0_67, %c0_68] : memref<1x8x32xf32, #tpu.memory_space<vmem>>, vector<1x8x32xf32>
      %c0_69 = arith.constant 0 : index
      %c0_70 = arith.constant 0 : index
      %c0_71 = arith.constant 0 : index
      %176 = vector.load %arg9[%c0_69, %c0_70, %c0_71] : memref<1x8x32xf32, #tpu.memory_space<vmem>>, vector<1x8x32xf32>
      tpu.vector_store %arg9[%c0_69, %c0_70, %c0_71], %175 {strides = array<i32>} : memref<1x8x32xf32, #tpu.memory_space<vmem>>, vector<1x8x32xf32>,
    } else {
    }
    %c0 = arith.constant 0 : index
    %c0_1 = arith.constant 0 : index
    %c0_2 = arith.constant 0 : index
    %3 = vector.load %arg9[%c0, %c0_1, %c0_2] : memref<1x8x32xf32, #tpu.memory_space<vmem>>, vector<1x8x32xf32>
    %4 = vector.shape_cast %3 : vector<1x8x32xf32> to vector<8x32xf32>
    %c0_3 = arith.constant 0 : index
    %c0_4 = arith.constant 0 : index
    %c0_5 = arith.constant 0 : index
    %5 = vector.load %arg8[%c0_3, %c0_4, %c0_5] : memref<1x16x128xf32, #tpu.memory_space<vmem>>, vector<1x16x128xf32>
    %6 = vector.shape_cast %5 : vector<1x16x128xf32> to vector<16x128xf32>
    %7 = vector.extract_strided_slice %6 {offsets = [0, 0], sizes = [1, 32], strides = [1, 1]} : vector<16x128xf32> to vector<1x32xf32>
    %8 = vector.extract_strided_slice %6 {offsets = [1, 0], sizes = [1, 32], strides = [1, 1]} : vector<16x128xf32> to vector<1x32xf32>
    %9 = vector.extract_strided_slice %6 {offsets = [2, 0], sizes = [1, 32], strides = [1, 1]} : vector<16x128xf32> to vector<1x32xf32>
    %10 = vector.extract_strided_slice %6 {offsets = [3, 0], sizes = [1, 32], strides = [1, 1]} : vector<16x128xf32> to vector<1x32xf32>
    %11 = vector.extract_strided_slice %6 {offsets = [4, 0], sizes = [1, 32], strides = [1, 1]} : vector<16x128xf32> to vector<1x32xf32>
    %12 = vector.extract_strided_slice %6 {offsets = [5, 0], sizes = [1, 32], strides = [1, 1]} : vector<16x128xf32> to vector<1x32xf32>
    %13 = vector.extract_strided_slice %6 {offsets = [6, 0], sizes = [1, 128], strides = [1, 1]} : vector<16x128xf32> to vector<1x128xf32>
    %14 = vector.extract_strided_slice %6 {offsets = [7, 0], sizes = [1, 32], strides = [1, 1]} : vector<16x128xf32> to vector<1x32xf32>
    %15 = vector.extract_strided_slice %6 {offsets = [8, 0], sizes = [1, 32], strides = [1, 1]} : vector<16x128xf32> to vector<1x32xf32>
    %cst = arith.constant dense<0.000000e+00> : vector<8xf32>
    %16 = vector.multi_reduction <add>, %4, %cst [1] : vector<8x32xf32> to vector<8xf32>
    %17 = vector.shape_cast %16 : vector<8xf32> to vector<8x1xf32>
    %cst_6 = arith.constant 3.200000e+01 : f32
    %18 = vector.broadcast %cst_6 : f32 to vector<8x1xf32>
    %19 = arith.divf %17, %18 : vector<8x1xf32>
    %20 = vector.broadcast %19 : vector<8x1xf32> to vector<8x32xf32>
    %21 = arith.subf %4, %20 : vector<8x32xf32>
    %22 = arith.mulf %21, %21 : vector<8x32xf32>
    %cst_7 = arith.constant dense<0.000000e+00> : vector<8xf32>
    %23 = vector.multi_reduction <add>, %22, %cst_7 [1] : vector<8x32xf32> to vector<8xf32>
    %24 = vector.shape_cast %23 : vector<8xf32> to vector<8x1xf32>
    %cst_8 = arith.constant 3.200000e+01 : f32
    %25 = vector.broadcast %cst_8 : f32 to vector<8x1xf32>
    %26 = arith.divf %24, %25 : vector<8x1xf32>
    %cst_9 = arith.constant 9.99999974E-6 : f32
    %27 = vector.broadcast %cst_9 : f32 to vector<8x1xf32>
    %28 = arith.addf %26, %27 : vector<8x1xf32>
    %29 = math.rsqrt %28 : vector<8x1xf32>
    %30 = vector.broadcast %29 : vector<8x1xf32> to vector<8x32xf32>
    %31 = arith.mulf %21, %30 : vector<8x32xf32>
    %32 = vector.broadcast %7 : vector<1x32xf32> to vector<8x32xf32>
    %33 = arith.mulf %31, %32 : vector<8x32xf32>
    %34 = vector.broadcast %8 : vector<1x32xf32> to vector<8x32xf32>
    %35 = arith.addf %33, %34 : vector<8x32xf32>
    %36 = arith.truncf %35 : vector<8x32xf32> to vector<8x32xbf16>
    %c0_10 = arith.constant 0 : index
    %c0_11 = arith.constant 0 : index
    %c0_12 = arith.constant 0 : index
    %37 = vector.load %arg3[%c0_10, %c0_11, %c0_12] : memref<1x32x1536xbf16, #tpu.memory_space<vmem>>, vector<1x32x1536xbf16>
    %38 = vector.shape_cast %37 : vector<1x32x1536xbf16> to vector<32x1536xbf16>
    %cst_13 = arith.constant dense<0.000000e+00> : vector<8x1536xf32>
    %39 = tpu.matmul %36, %38, %cst_13 {dimension_numbers = #tpu.dot_dimension_numbers<[1], [0], [0], [1], [0, 0, 1, 1], [], []>} : vector<8x32xbf16>, vector<32x1536xbf16>, vector<8x1536xf32> -> vector<8x1536xf32>
    %c0_14 = arith.constant 0 : index
    %c0_15 = arith.constant 0 : index
    %c0_16 = arith.constant 0 : index
    %40 = vector.load %arg4[%c0_14, %c0_15, %c0_16] : memref<1x1x1536xf32, #tpu.memory_space<vmem>>, vector<1x1x1536xf32>
    %41 = vector.shape_cast %40 : vector<1x1x1536xf32> to vector<1x1536xf32>
    %42 = vector.broadcast %41 : vector<1x1536xf32> to vector<8x1536xf32>
    %43 = arith.addf %39, %42 : vector<8x1536xf32>
    %44 = arith.truncf %43 : vector<8x1536xf32> to vector<8x1536xbf16>
    %45 = vector.extract_strided_slice %44 {offsets = [0, 0], sizes = [8, 512], strides = [1, 1]} : vector<8x1536xbf16> to vector<8x512xbf16>
    %46 = vector.extract_strided_slice %44 {offsets = [0, 512], sizes = [8, 512], strides = [1, 1]} : vector<8x1536xbf16> to vector<8x512xbf16>
    %47 = vector.extract_strided_slice %44 {offsets = [0, 1024], sizes = [8, 512], strides = [1, 1]} : vector<8x1536xbf16> to vector<8x512xbf16>
    %48 = vector.extract_strided_slice %45 {offsets = [0, 0], sizes = [8, 128], strides = [1, 1]} : vector<8x512xbf16> to vector<8x128xbf16>
    %49 = vector.extract_strided_slice %45 {offsets = [0, 128], sizes = [8, 128], strides = [1, 1]} : vector<8x512xbf16> to vector<8x128xbf16>
    %50 = vector.extract_strided_slice %45 {offsets = [0, 256], sizes = [8, 128], strides = [1, 1]} : vector<8x512xbf16> to vector<8x128xbf16>
    %51 = vector.extract_strided_slice %45 {offsets = [0, 384], sizes = [8, 128], strides = [1, 1]} : vector<8x512xbf16> to vector<8x128xbf16>
    %52 = vector.shape_cast %48 : vector<8x128xbf16> to vector<1x8x128xbf16>
    %53 = vector.shape_cast %49 : vector<8x128xbf16> to vector<1x8x128xbf16>
    %54 = vector.shape_cast %50 : vector<8x128xbf16> to vector<1x8x128xbf16>
    %55 = vector.shape_cast %51 : vector<8x128xbf16> to vector<1x8x128xbf16>
    %56 = tpu.concatenate %52, %53, %54, %55 in 0 : vector<1x8x128xbf16>, vector<1x8x128xbf16>, vector<1x8x128xbf16>, vector<1x8x128xbf16> -> vector<4x8x128xbf16>
    %57 = vector.extract_strided_slice %46 {offsets = [0, 0], sizes = [8, 128], strides = [1, 1]} : vector<8x512xbf16> to vector<8x128xbf16>
    %58 = vector.extract_strided_slice %46 {offsets = [0, 128], sizes = [8, 128], strides = [1, 1]} : vector<8x512xbf16> to vector<8x128xbf16>
    %59 = vector.extract_strided_slice %46 {offsets = [0, 256], sizes = [8, 128], strides = [1, 1]} : vector<8x512xbf16> to vector<8x128xbf16>
    %60 = vector.extract_strided_slice %46 {offsets = [0, 384], sizes = [8, 128], strides = [1, 1]} : vector<8x512xbf16> to vector<8x128xbf16>
    %61 = vector.shape_cast %57 : vector<8x128xbf16> to vector<1x8x128xbf16>
    %62 = vector.shape_cast %58 : vector<8x128xbf16> to vector<1x8x128xbf16>
    %63 = vector.shape_cast %59 : vector<8x128xbf16> to vector<1x8x128xbf16>
    %64 = vector.shape_cast %60 : vector<8x128xbf16> to vector<1x8x128xbf16>
    %65 = tpu.concatenate %61, %62, %63, %64 in 0 : vector<1x8x128xbf16>, vector<1x8x128xbf16>, vector<1x8x128xbf16>, vector<1x8x128xbf16> -> vector<4x8x128xbf16>
    %c0_17 = arith.constant 0 : index
    %c0_18 = arith.constant 0 : index
    %c0_19 = arith.constant 0 : index
    %66 = vector.load %arg10[%c0_17, %c0_18, %c0_19] : memref<4x8x128xbf16, #tpu.memory_space<vmem>>, vector<4x8x128xbf16>
    tpu.vector_store %arg10[%c0_17, %c0_18, %c0_19], %65 {strides = array<i32>} : memref<4x8x128xbf16, #tpu.memory_space<vmem>>, vector<4x8x128xbf16>,
    %67 = vector.extract_strided_slice %47 {offsets = [0, 0], sizes = [8, 128], strides = [1, 1]} : vector<8x512xbf16> to vector<8x128xbf16>
    %68 = vector.extract_strided_slice %47 {offsets = [0, 128], sizes = [8, 128], strides = [1, 1]} : vector<8x512xbf16> to vector<8x128xbf16>
    %69 = vector.extract_strided_slice %47 {offsets = [0, 256], sizes = [8, 128], strides = [1, 1]} : vector<8x512xbf16> to vector<8x128xbf16>
    %70 = vector.extract_strided_slice %47 {offsets = [0, 384], sizes = [8, 128], strides = [1, 1]} : vector<8x512xbf16> to vector<8x128xbf16>
    %71 = vector.shape_cast %67 : vector<8x128xbf16> to vector<1x8x128xbf16>
    %72 = vector.shape_cast %68 : vector<8x128xbf16> to vector<1x8x128xbf16>
    %73 = vector.shape_cast %69 : vector<8x128xbf16> to vector<1x8x128xbf16>
    %74 = vector.shape_cast %70 : vector<8x128xbf16> to vector<1x8x128xbf16>
    %75 = tpu.concatenate %71, %72, %73, %74 in 0 : vector<1x8x128xbf16>, vector<1x8x128xbf16>, vector<1x8x128xbf16>, vector<1x8x128xbf16> -> vector<4x8x128xbf16>
    %c0_20 = arith.constant 0 : index
    %c0_21 = arith.constant 0 : index
    %c0_22 = arith.constant 0 : index
    %76 = vector.load %arg11[%c0_20, %c0_21, %c0_22] : memref<4x8x128xbf16, #tpu.memory_space<vmem>>, vector<4x8x128xbf16>
    tpu.vector_store %arg11[%c0_20, %c0_21, %c0_22], %75 {strides = array<i32>} : memref<4x8x128xbf16, #tpu.memory_space<vmem>>, vector<4x8x128xbf16>,
    %77 = tpu.iota {dimensions = array<i32: 0>} : vector<8x8xi32>
    %c0_i32_23 = arith.constant 0 : i32
    %78 = vector.broadcast %c0_i32_23 : i32 to vector<8x8xi32>
    %79 = arith.addi %78, %77 : vector<8x8xi32>
    %cst_24 = arith.constant -1.000000e+30 : f32
    %80 = vector.broadcast %cst_24 : f32 to vector<4x8x1xf32>
    %cst_25 = arith.constant 0.000000e+00 : f32
    %81 = vector.broadcast %cst_25 : f32 to vector<4x8x1xf32>
    %cst_26 = arith.constant 0.000000e+00 : f32
    %82 = vector.broadcast %cst_26 : f32 to vector<4x8x128xf32>
    %c0_27 = arith.constant 0 : index
    %c0_28 = arith.constant 0 : index
    %c0_29 = arith.constant 0 : index
    %83 = vector.load %arg10[%c0_27, %c0_28, %c0_29] : memref<4x8x128xbf16, #tpu.memory_space<vmem>>, vector<4x8x128xbf16>
    %c0_30 = arith.constant 0 : index
    %c0_31 = arith.constant 0 : index
    %c0_32 = arith.constant 0 : index
    %84 = vector.load %arg11[%c0_30, %c0_31, %c0_32] : memref<4x8x128xbf16, #tpu.memory_space<vmem>>, vector<4x8x128xbf16>
    "tpu.trace_start"() <{level = 10 : i32, message = "htd,hsd->hts"}> : () -> ()
    %cst_33 = arith.constant dense<0.000000e+00> : vector<4x8x8xf32>
    %85 = tpu.matmul %56, %83, %cst_33 {dimension_numbers = #tpu.dot_dimension_numbers<[2], [2], [1], [1], [0, 0, 0, 1, 1, 1], [0], [0]>} : vector<4x8x128xbf16>, vector<4x8x128xbf16>, vector<4x8x8xf32> -> vector<4x8x8xf32>
    "tpu.trace_stop"() : () -> ()
    %86 = tpu.iota {dimensions = array<i32: 1>} : vector<8x8xi32>
    %c0_i32_34 = arith.constant 0 : i32
    %87 = vector.broadcast %c0_i32_34 : i32 to vector<8x8xi32>
    %88 = arith.addi %87, %86 : vector<8x8xi32>
    %89 = arith.cmpi sge, %79, %88 : vector<8x8xi32>
    %90 = vector.shape_cast %89 : vector<8x8xi1> to vector<1x8x8xi1>
    %cst_35 = arith.constant -1.000000e+30 : f32
    %91 = vector.shape_cast %90 : vector<1x8x8xi1> to vector<1x8x8xi1>
    %92 = vector.broadcast %91 : vector<1x8x8xi1> to vector<4x8x8xi1>
    %93 = vector.broadcast %cst_35 : f32 to vector<4x8x8xf32>
    %94 = arith.select %92, %85, %93 : vector<4x8x8xi1>, vector<4x8x8xf32>
    %cst_36 = arith.constant dense<0xFF800000> : vector<4x8xf32>
    %95 = vector.multi_reduction <maximumf>, %94, %cst_36 [2] : vector<4x8x8xf32> to vector<4x8xf32>
    %96 = vector.shape_cast %95 : vector<4x8xf32> to vector<4x8x1xf32>
    %97 = arith.maximumf %80, %96 : vector<4x8x1xf32>
    %98 = arith.subf %80, %97 : vector<4x8x1xf32>
    %99 = math.exp %98 : vector<4x8x1xf32>
    %100 = vector.broadcast %97 : vector<4x8x1xf32> to vector<4x8x8xf32>
    %101 = arith.subf %94, %100 : vector<4x8x8xf32>
    %102 = math.exp %101 : vector<4x8x8xf32>
    %103 = arith.mulf %99, %81 : vector<4x8x1xf32>
    %cst_37 = arith.constant dense<0.000000e+00> : vector<4x8xf32>
    %104 = vector.multi_reduction <add>, %102, %cst_37 [2] : vector<4x8x8xf32> to vector<4x8xf32>
    %105 = vector.shape_cast %104 : vector<4x8xf32> to vector<4x8x1xf32>
    %106 = arith.addf %103, %105 : vector<4x8x1xf32>
    %107 = vector.broadcast %99 : vector<4x8x1xf32> to vector<4x8x128xf32>
    %108 = arith.mulf %107, %82 : vector<4x8x128xf32>
    %109 = arith.truncf %102 : vector<4x8x8xf32> to vector<4x8x8xbf16>
    "tpu.trace_start"() <{level = 10 : i32, message = "hts,hsd->htd"}> : () -> ()
    %cst_38 = arith.constant dense<0.000000e+00> : vector<4x8x128xf32>
    %110 = tpu.matmul %109, %84, %cst_38 {dimension_numbers = #tpu.dot_dimension_numbers<[2], [1], [1], [2], [0, 0, 0, 1, 1, 2], [0], [0]>} : vector<4x8x8xbf16>, vector<4x8x128xbf16>, vector<4x8x128xf32> -> vector<4x8x128xf32>
    "tpu.trace_stop"() : () -> ()
    %111 = arith.addf %108, %110 : vector<4x8x128xf32>
    %112 = tpu.reciprocal %106 {approx = true} : vector<4x8x1xf32> -> vector<4x8x1xf32>
    %113 = vector.broadcast %112 : vector<4x8x1xf32> to vector<4x8x128xf32>
    %114 = arith.mulf %111, %113 : vector<4x8x128xf32>
    %115 = arith.truncf %114 : vector<4x8x128xf32> to vector<4x8x128xbf16>
    %c0_39 = arith.constant 0 : index
    %c0_40 = arith.constant 0 : index
    %c0_41 = arith.constant 0 : index
    %c0_42 = arith.constant 0 : index
    %116 = vector.load %arg5[%c0_39, %c0_40, %c0_41, %c0_42] : memref<1x4x128x32xbf16, #tpu.memory_space<vmem>>, vector<1x4x128x32xbf16>
    %117 = vector.shape_cast %116 : vector<1x4x128x32xbf16> to vector<4x128x32xbf16>
    "tpu.trace_start"() <{level = 10 : i32, message = "htd,hdc->htc"}> : () -> ()
    %cst_43 = arith.constant dense<0.000000e+00> : vector<4x8x32xf32>
    %118 = tpu.matmul %115, %117, %cst_43 {dimension_numbers = #tpu.dot_dimension_numbers<[2], [1], [1], [2], [0, 0, 0, 1, 1, 2], [0], [0]>} : vector<4x8x128xbf16>, vector<4x128x32xbf16>, vector<4x8x32xf32> -> vector<4x8x32xf32>
    "tpu.trace_stop"() : () -> ()
    %cst_44 = arith.constant dense<0.000000e+00> : vector<8x32xf32>
    %119 = vector.multi_reduction <add>, %118, %cst_44 [0] : vector<4x8x32xf32> to vector<8x32xf32>
    %120 = vector.broadcast %11 : vector<1x32xf32> to vector<8x32xf32>
    %121 = arith.addf %119, %120 : vector<8x32xf32>
    %122 = arith.addf %4, %121 : vector<8x32xf32>
    %cst_45 = arith.constant dense<0.000000e+00> : vector<8xf32>
    %123 = vector.multi_reduction <add>, %122, %cst_45 [1] : vector<8x32xf32> to vector<8xf32>
    %124 = vector.shape_cast %123 : vector<8xf32> to vector<8x1xf32>
    %cst_46 = arith.constant 3.200000e+01 : f32
    %125 = vector.broadcast %cst_46 : f32 to vector<8x1xf32>
    %126 = arith.divf %124, %125 : vector<8x1xf32>
    %127 = vector.broadcast %126 : vector<8x1xf32> to vector<8x32xf32>
    %128 = arith.subf %122, %127 : vector<8x32xf32>
    %129 = arith.mulf %128, %128 : vector<8x32xf32>
    %cst_47 = arith.constant dense<0.000000e+00> : vector<8xf32>
    %130 = vector.multi_reduction <add>, %129, %cst_47 [1] : vector<8x32xf32> to vector<8xf32>
    %131 = vector.shape_cast %130 : vector<8xf32> to vector<8x1xf32>
    %cst_48 = arith.constant 3.200000e+01 : f32
    %132 = vector.broadcast %cst_48 : f32 to vector<8x1xf32>
    %133 = arith.divf %131, %132 : vector<8x1xf32>
    %cst_49 = arith.constant 9.99999974E-6 : f32
    %134 = vector.broadcast %cst_49 : f32 to vector<8x1xf32>
    %135 = arith.addf %133, %134 : vector<8x1xf32>
    %136 = math.rsqrt %135 : vector<8x1xf32>
    %137 = vector.broadcast %136 : vector<8x1xf32> to vector<8x32xf32>
    %138 = arith.mulf %128, %137 : vector<8x32xf32>
    %139 = vector.broadcast %9 : vector<1x32xf32> to vector<8x32xf32>
    %140 = arith.mulf %138, %139 : vector<8x32xf32>
    %141 = vector.broadcast %10 : vector<1x32xf32> to vector<8x32xf32>
    %142 = arith.addf %140, %141 : vector<8x32xf32>
    %143 = arith.truncf %142 : vector<8x32xf32> to vector<8x32xbf16>
    %c0_50 = arith.constant 0 : index
    %c0_51 = arith.constant 0 : index
    %c0_52 = arith.constant 0 : index
    %144 = vector.load %arg6[%c0_50, %c0_51, %c0_52] : memref<1x32x128xbf16, #tpu.memory_space<vmem>>, vector<1x32x128xbf16>
    %145 = vector.shape_cast %144 : vector<1x32x128xbf16> to vector<32x128xbf16>
    %cst_53 = arith.constant dense<0.000000e+00> : vector<8x128xf32>
    %146 = tpu.matmul %143, %145, %cst_53 {dimension_numbers = #tpu.dot_dimension_numbers<[1], [0], [0], [1], [0, 0, 1, 1], [], []>} : vector<8x32xbf16>, vector<32x128xbf16>, vector<8x128xf32> -> vector<8x128xf32>
    %147 = vector.broadcast %13 : vector<1x128xf32> to vector<8x128xf32>
    %148 = arith.addf %146, %147 : vector<8x128xf32>
    %cst_54 = arith.constant 5.000000e-01 : f32
    %149 = vector.broadcast %cst_54 : f32 to vector<8x128xf32>
    %150 = arith.mulf %149, %148 : vector<8x128xf32>
    %cst_55 = arith.constant 4.471500e-02 : f32
    %151 = vector.broadcast %cst_55 : f32 to vector<8x128xf32>
    %152 = arith.mulf %151, %148 : vector<8x128xf32>
    %153 = arith.mulf %152, %148 : vector<8x128xf32>
    %154 = arith.mulf %153, %148 : vector<8x128xf32>
    %155 = arith.addf %148, %154 : vector<8x128xf32>
    %cst_56 = arith.constant 0.797884583 : f32
    %156 = vector.broadcast %cst_56 : f32 to vector<8x128xf32>
    %157 = arith.mulf %156, %155 : vector<8x128xf32>
    %158 = math.tanh %157 : vector<8x128xf32>
    %cst_57 = arith.constant 1.000000e+00 : f32
    %159 = vector.broadcast %cst_57 : f32 to vector<8x128xf32>
    %160 = arith.addf %159, %158 : vector<8x128xf32>
    %161 = arith.mulf %150, %160 : vector<8x128xf32>
    %162 = arith.truncf %161 : vector<8x128xf32> to vector<8x128xbf16>
    %c0_58 = arith.constant 0 : index
    %c0_59 = arith.constant 0 : index
    %c0_60 = arith.constant 0 : index
    %163 = vector.load %arg7[%c0_58, %c0_59, %c0_60] : memref<1x128x32xbf16, #tpu.memory_space<vmem>>, vector<1x128x32xbf16>
    %164 = vector.shape_cast %163 : vector<1x128x32xbf16> to vector<128x32xbf16>
    %cst_61 = arith.constant dense<0.000000e+00> : vector<8x32xf32>
    %165 = tpu.matmul %162, %164, %cst_61 {dimension_numbers = #tpu.dot_dimension_numbers<[1], [0], [0], [1], [0, 0, 1, 1], [], []>} : vector<8x128xbf16>, vector<128x32xbf16>, vector<8x32xf32> -> vector<8x32xf32>
    %166 = vector.broadcast %12 : vector<1x32xf32> to vector<8x32xf32>
    %167 = arith.addf %165, %166 : vector<8x32xf32>
    %168 = arith.addf %122, %167 : vector<8x32xf32>
    %c0_62 = arith.constant 0 : index
    %c0_63 = arith.constant 0 : index
    %c0_64 = arith.constant 0 : index
    %169 = vector.load %arg9[%c0_62, %c0_63, %c0_64] : memref<1x8x32xf32, #tpu.memory_space<vmem>>, vector<1x8x32xf32>
    %170 = vector.shape_cast %169 : vector<1x8x32xf32> to vector<8x32xf32>
    %171 = vector.shape_cast %168 : vector<8x32xf32> to vector<1x8x32xf32>
    tpu.vector_store %arg9[%c0_62, %c0_63, %c0_64], %171 {strides = array<i32>} : memref<1x8x32xf32, #tpu.memory_space<vmem>>, vector<1x8x32xf32>,
    %c1_i32 = arith.constant 1 : i32
    %172 = arith.cmpi eq, %arg1, %c1_i32 : i32
    %173 = arith.extui %172 : i1 to i32
    %c0_i32_65 = arith.constant 0 : i32
    %174 = arith.cmpi ne, %173, %c0_i32_65 : i32
    scf.if %174 {
      %cst_66 = arith.constant dense<0.000000e+00> : vector<8xf32>
      %175 = vector.multi_reduction <add>, %168, %cst_66 [1] : vector<8x32xf32> to vector<8xf32>
      %176 = vector.shape_cast %175 : vector<8xf32> to vector<8x1xf32>
      %cst_67 = arith.constant 3.200000e+01 : f32
      %177 = vector.broadcast %cst_67 : f32 to vector<8x1xf32>
      %178 = arith.divf %176, %177 : vector<8x1xf32>
      %179 = vector.broadcast %178 : vector<8x1xf32> to vector<8x32xf32>
      %180 = arith.subf %168, %179 : vector<8x32xf32>
      %181 = arith.mulf %180, %180 : vector<8x32xf32>
      %cst_68 = arith.constant dense<0.000000e+00> : vector<8xf32>
      %182 = vector.multi_reduction <add>, %181, %cst_68 [1] : vector<8x32xf32> to vector<8xf32>
      %183 = vector.shape_cast %182 : vector<8xf32> to vector<8x1xf32>
      %cst_69 = arith.constant 3.200000e+01 : f32
      %184 = vector.broadcast %cst_69 : f32 to vector<8x1xf32>
      %185 = arith.divf %183, %184 : vector<8x1xf32>
      %cst_70 = arith.constant 9.99999974E-6 : f32
      %186 = vector.broadcast %cst_70 : f32 to vector<8x1xf32>
      %187 = arith.addf %185, %186 : vector<8x1xf32>
      %188 = math.rsqrt %187 : vector<8x1xf32>
      %189 = vector.broadcast %188 : vector<8x1xf32> to vector<8x32xf32>
      %190 = arith.mulf %180, %189 : vector<8x32xf32>
      %191 = vector.broadcast %14 : vector<1x32xf32> to vector<8x32xf32>
      %192 = arith.mulf %190, %191 : vector<8x32xf32>
      %193 = vector.broadcast %15 : vector<1x32xf32> to vector<8x32xf32>
      %194 = arith.addf %192, %193 : vector<8x32xf32>
      %c0_71 = arith.constant 0 : index
      %c0_72 = arith.constant 0 : index
      %c0_73 = arith.constant 0 : index
      %195 = vector.load %arg9[%c0_71, %c0_72, %c0_73] : memref<1x8x32xf32, #tpu.memory_space<vmem>>, vector<1x8x32xf32>
      %196 = vector.shape_cast %195 : vector<1x8x32xf32> to vector<8x32xf32>
      %197 = vector.shape_cast %194 : vector<8x32xf32> to vector<1x8x32xf32>
      tpu.vector_store %arg9[%c0_71, %c0_72, %c0_73], %197 {strides = array<i32>} : memref<1x8x32xf32, #tpu.memory_space<vmem>>, vector<1x8x32xf32>,
    } else {
    }
    return
  }
  func.func @transform_0(%arg0: i32, %arg1: i32) -> (i32, i32, i32) {
    %c0_i32 = arith.constant 0 : i32
    %c0_i32_0 = arith.constant 0 : i32
    %c0_i32_1 = arith.constant 0 : i32
    return %arg0, %c0_i32, %c0_i32_0 : i32, i32, i32
  }
  func.func @transform_1(%arg0: i32, %arg1: i32) -> (i32, i32, i32) {
    %c0_i32 = arith.constant 0 : i32
    %c0_i32_0 = arith.constant 0 : i32
    %c0_i32_1 = arith.constant 0 : i32
    return %arg1, %c0_i32, %c0_i32_0 : i32, i32, i32
  }
  func.func @transform_2(%arg0: i32, %arg1: i32) -> (i32, i32, i32) {
    %c0_i32 = arith.constant 0 : i32
    %c0_i32_0 = arith.constant 0 : i32
    %c0_i32_1 = arith.constant 0 : i32
    return %arg1, %c0_i32, %c0_i32_0 : i32, i32, i32
  }
  func.func @transform_3(%arg0: i32, %arg1: i32) -> (i32, i32, i32, i32) {
    %c0_i32 = arith.constant 0 : i32
    %c0_i32_0 = arith.constant 0 : i32
    %c0_i32_1 = arith.constant 0 : i32
    %c0_i32_2 = arith.constant 0 : i32
    return %arg1, %c0_i32, %c0_i32_0, %c0_i32_1 : i32, i32, i32, i32
  }
  func.func @transform_4(%arg0: i32, %arg1: i32) -> (i32, i32, i32) {
    %c0_i32 = arith.constant 0 : i32
    %c0_i32_0 = arith.constant 0 : i32
    %c0_i32_1 = arith.constant 0 : i32
    return %arg1, %c0_i32, %c0_i32_0 : i32, i32, i32
  }
  func.func @transform_5(%arg0: i32, %arg1: i32) -> (i32, i32, i32) {
    %c0_i32 = arith.constant 0 : i32
    %c0_i32_0 = arith.constant 0 : i32
    %c0_i32_1 = arith.constant 0 : i32
    return %arg1, %c0_i32, %c0_i32_0 : i32, i32, i32
  }
  func.func @transform_6(%arg0: i32, %arg1: i32) -> (i32, i32, i32) {
    %c0_i32 = arith.constant 0 : i32
    %c0_i32_0 = arith.constant 0 : i32
    %c0_i32_1 = arith.constant 0 : i32
    return %arg1, %c0_i32, %c0_i32_0 : i32, i32, i32
  }
  func.func @transform_7(%arg0: i32, %arg1: i32) -> (i32, i32, i32) {
    %c0_i32 = arith.constant 0 : i32
    %c0_i32_0 = arith.constant 0 : i32
    %c0_i32_1 = arith.constant 0 : i32
    return %arg0, %c0_i32, %c0_i32_0 : i32, i32, i32
  }
}

</mosaic_0001>

<bundles_post_ra>
// kernel: tpu_custom_call.1
= control target key start
LH: loop header
LB: loop body
LE: loop exit
PB: predicated region body
PF: predicated region fallthrough
CT: control target
= control target key end

     0   :  { %s2687_s0 = inlined_call_operand.vmem [shape: f32[2,8,32], index: 0, kind: input, shape index: {}]   ;;  %s2688_s1 = inlined_call_operand.vmem [shape: bf16[2,32,1536], index: 1, kind: input, shape index: {}]   ;;  %s2689_s2 = inlined_call_operand.vmem [shape: f32[2,1,1536], index: 2, kind: input, shape index: {}]   ;;  %s2690_s3 = inlined_call_operand.vmem [shape: bf16[2,4,128,32], index: 3, kind: input, shape index: {}]   ;;  %s2691_s4 = inlined_call_operand.vmem [shape: bf16[2,32,128], index: 4, kind: input, shape index: {}]   ;;  %s2692_s5 = inlined_call_operand.vmem [shape: bf16[2,128,32], index: 5, kind: input, shape index: {}]   ;;  %s2693_s6 = inlined_call_operand.vmem [shape: f32[2,16,128], index: 6, kind: input, shape index: {}]   ;;  %s2694_s7 = inlined_call_operand.hbm [shape: f32[2,8,32], index: 7, kind: output, shape index: {}]  }
   0x1   :  { %2704 = sst [smem:[#allocation16_spill]] %s2687_s0 }
   0x2   :  { %12 = vsyncpa [#allocation5], 0 }
   0x3   :  { %14 = vsyncpa [#allocation5 + $0x1], 0  ;;  %s2316_s24 = smov 0   ;;  %s2318_s25 = smov 0  }
   0x4   :  { %s2320_s26 = smov 0   ;;  %s2322_s27 = smov 0  }
   0x5   :  { %s2324_s28 = smov 0   ;;  %s2326_s29 = smov 0  }
   0x6   :  { %s2328_s30 = smov 0   ;;  %s2330_s8 = smov 0  }
   0x7 LB: > { %2705 = sst [smem:[#allocation7_spill]] %s2245_s24  ;;  %s1698_s9 = sadd.s32 4294967295, %s2273_s8   ;;  %s2273_s8 = sphi %s2330_s8, %s20_s8   ;;  %s2269_s30 = sphi %s2328_s30, %s2726_s30   ;;  %s2265_s29 = sphi %s2326_s29, %s2725_s29   ;;  %s2261_s28 = sphi %s2324_s28, %s2724_s28   ;;  %s2257_s27 = sphi %s2322_s27, %s2723_s27   ;;  %s2253_s26 = sphi %s2320_s26, %s2722_s26   ;;  %s2249_s25 = sphi %s2318_s25, %s2728_s25   ;;  %s2245_s24 = sphi %s2316_s24, %s2727_s24  }
   0x8   : > { %2706 = sst [smem:[#allocation8_spill]] %s2253_s26  ;;  %s1699_s10 = sadd.s32 4294967294, %s2273_s8  }
   0x9   : > { %2707 = sst [smem:[#allocation9_spill]] %s2265_s29  ;;  %s29_s11 = sadd.s32 1, %s2265_s29 }
   0xa   : > { %2708 = sst [smem:[#allocation10_spill]] %s2269_s30  ;;  %p30_p0 = scmp.ge.s32.totalorder %s29_s11, 2 }
   0xb   : > { %2709 = sst [smem:[#allocation11_spill]] %s2273_s8  ;;  %s32_s12 = sadd.s32 1, %s2269_s30 }
   0xc   : > { %p231_p1 = scmp.ne.s32.totalorder %s2253_s26, %s2249_s25  ;;  %p232_p2 = scmp.eq.s32.totalorder %s1698_s9, 3 }
   0xd   : > { %s2730_s11 = smov (%p30_p0, %s29_s11), 0  ;;  %s2732_s12 = smov (!%p30_p0, %s32_s12), %s2269_s30 }
   0xe   : > { %2710 = sst [smem:[#allocation12_spill]] %s2730_s11  ;;  %p2365_p3 = por %p232_p2, %p231_p1 }
   0xf   : > { %p237_p4 = scmp.ne.s32.totalorder %s2249_s25, %s2245_s24  ;;  %p34_p5 = scmp.ge.s32.totalorder %s2732_s12, 2 }
  0x10   : > { %p238_p6 = scmp.eq.s32.totalorder %s1699_s10, 3  ;;  %p1702_p7 = scmp.ge.s32.totalorder %s2273_s8, 1 }
  0x11   : > { %p310_p8 = scmp.lt.s32.totalorder %s2273_s8, 5  ;;  %s2734_s12 = smov (%p34_p5, %s2732_s12), 0 }
  0x12   : > { %2712 = sst [smem:[#allocation13_spill]] %s2734_s12  ;;  %p2375_p9 = por %p238_p6, %p237_p4 }
  0x13   : > { %p311_p10 = pnand %p1702_p7, %p310_p8  ;;  %s218_s15 = ssub.s32 %s2269_s30, %s2734_s12 }
  0x14   : > { %s2713_s14 = scalar_select %p2375_p9, 1, 0 }
  0x15   : > { %s221_s16 = sadd.s32 1, %s2253_s26  ;;  %p219_p11 = scmp.eq.s32.totalorder %s218_s15, 0 }
  0x16   : > { %2714 = sst [smem:[#allocation14_spill]] %s2713_s14  ;;  %314 = sbr.rel (%p311_p10) target bundleno = 1894 (0x766), region = 48 }
  0x17   : > { %s2383_s17 = scalar_select %p219_p11, %s2253_s26, %s221_s16  }
  0x18   : > { %s2699_s18 = sand.u32 (!%p311_p10), 1, %s2249_s25   ;;  %p370_p12 = scmp.lt.s32.totalorder (!%p311_p10), %s2261_s28, 1 }
  0x19   : > { %2715 = sst [smem:[#allocation15_spill]] %s2383_s17  ;;  %s1703_s19 = sshll.u32 (!%p311_p10), %s2699_s18, 3 }
  0x1a   : > { %p374_p13 = scmp.lt.s32.totalorder (!%p311_p10), %s2257_s27, 1  ;;  %s2716_s0 = sld [smem:[#allocation16_spill]] (!%p311_p10) }
  0x1b   : > { %s371_s20 = scalar_select %p370_p12, %s2261_s28, 1 }
  0x1c   : > { %s375_s21 = scalar_select %p374_p13, %s2257_s27, 1 }
  0x1d   : > { %s1704_s22 = sshll.u32 %s371_s20, 3  ;;  %s2425_s24 = scalar_lea.vmem [#allocation4], %s1703_s19 }
  0x1e   : > { %s2071_s15 = smul.u32 192, %s375_s21  ;;  %s2001_s12 = sshll.u32 %s375_s21, 8 }
  0x1f   : > { %s2072_s16 = smul.u32 12, %s375_s21  ;;  %s2403_s18 = scalar_lea.vmem %s2690_s3, %s2001_s12 }
  0x20   : > { %s373_s10 = scalar_lea.vmem %s2716_s0, %s1704_s22  ;;  %s2398_s29 = scalar_lea.vmem %s2688_s1, %s2071_s15 }
  0x21   : > { %s2408_s20 = scalar_lea.vmem %s2689_s2, %s2072_s16  ;;  %s2002_s23 = sshll.u32 %s375_s21, 4 }
  0x22   : > { %s2413_s0 = scalar_lea.vmem %s2691_s4, %s2002_s23  ;;  %s2003_s8 = sshll.u32 %s375_s21, 6 }
  0x23   : > { %s2418_s15 = scalar_lea.vmem %s2692_s5, %s2003_s8  ;;  %s2423_s17 = scalar_lea.vmem %s2693_s6, %s2002_s23 }
  0x24   : > { %p1714_p0 = scmp.ne.s32.totalorder %s2257_s27, 0 }
  0x26   : > { %407 = sbr.rel (%p1714_p0) target bundleno = 45 (0x2d), region = 52 }
  0x2b   : > { %v408_v0 = vld [vmem:[%s373_s10] sm:$0xff]  ;;  %vm409_vm0 = vcmask 261120  }
  0x2c   : > { %410 = vst.msk [vmem:[%s2425_s24] sm:$0xff] %vm409_vm0, %v408_v0 }
  0x2d PF: > { %vm414_vm1 = vcmask 261120   ;;  %v2275_v3 = vmov 32.0   ;;  %v1765_v15 = vld [vmem:[%s2398_s29 + $0x60] sm:$0xf]  ;;  %v2023_v16 = vld [vmem:[%s2398_s29 + $0x8c] sm:$0xf0] }
  0x2e   : > { %2145 = vrcp.f32 %v2275_v3  ;;  %v2017_v17 = vld [vmem:[%s2398_s29 + $0x64] sm:$0xf]  ;;  %v1766_v18 = vor.u32 %v2023_v16, %v1765_v15  ;;  %v1767_v19 = vld [vmem:[%s2398_s29 + $0x90] sm:$0xf0]  ;;  %v2018_v20 = vld [vmem:[%s2398_s29 + $0x6c] sm:$0xf] }
  0x2f   : > { %v1775_v21 = vld [vmem:[%s2398_s29 + $0x98] sm:$0xf0]  ;;  %v1770_v22 = vor.u32 %v2017_v17, %v1767_v19  ;;  %v2019_v24 = vld [vmem:[%s2398_s29 + $0x74] sm:$0xf]  ;;  %v1783_v25 = vld [vmem:[%s2398_s29 + $0xa0] sm:$0xf0] }
  0x30   : > { %v1778_v23 = vor.u32 %v2018_v20, %v1775_v21  ;;  %630 = vmatpush.bf16.msra.mxu0 %v1766_v18  ;;  %v1786_v26 = vor.u32 %v2019_v24, %v1783_v25  ;;  %v1717_v27 = vld [vmem:[%s2398_s29] sm:$0xf]  ;;  %v2011_v28 = vld [vmem:[%s2398_s29 + $0x2c] sm:$0xf0]  ;;  %v2005_v29 = vld [vmem:[%s2398_s29 + $0x4] sm:$0xf] }
  0x31   : > { %643 = vmatpush.bf16.msra.mxu2 %v1770_v22  ;;  %v1718_v30 = vor.u32 %v2011_v28, %v1717_v27  ;;  %v1719_v31 = vld [vmem:[%s2398_s29 + $0x30] sm:$0xf0]  ;;  %v2006_v32 = vld [vmem:[%s2398_s29 + $0xc] sm:$0xf]  ;;  %v1727_v33 = vld [vmem:[%s2398_s29 + $0x38] sm:$0xf0] }
  0x32   : > { %669 = vmatpush.bf16.msra.mxu3 %v1778_v23  ;;  %695 = vmatpush.bf16.msra.mxu1 %v1786_v26  ;;  %v1722_v34 = vor.u32 %v2005_v29, %v1719_v31  ;;  %v1730_v35 = vor.u32 %v2006_v32, %v1727_v33  ;;  %v2007_v36 = vld [vmem:[%s2398_s29 + $0x14] sm:$0xf]  ;;  %v1735_v37 = vld [vmem:[%s2398_s29 + $0x40] sm:$0xf0]  ;;  %v2460_v39 = vld [vmem:[%s2423_s17 + $0x8] sm:$0xff]  ;;  %vm951_vm6 = vcmask 1043456  }
  0x33   : > { %v2430_v1 = vld [vmem:[%s2425_s24] sm:$0xff]  ;;  %v1738_v38 = vor.u32 %v2007_v36, %v1735_v37  ;;  %v2024_v42 = vld [vmem:[%s2398_s29 + $0x94] sm:$0xf0]  ;;  %v1781_v43 = vld [vmem:[%s2398_s29 + $0x70] sm:$0xf]  ;;  %vm883_vm8 = vcmask 64512  }
  0x34   : > { %v415_v2 = vsel %vm414_vm1, %v2430_v1, 0.0  ;;  %v2146_v4 = vpop.eup %2145  ;;  %631 = vmatpush.bf16.msra.mxu0 %v1718_v30  ;;  %v1773_v41 = vld [vmem:[%s2398_s29 + $0x68] sm:$0xf]  ;;  %v2025_v46 = vld [vmem:[%s2398_s29 + $0x9c] sm:$0xf0]  ;;  %p1996_p1 = scmp.ne.s32.totalorder %s2257_s27, 1 }
  0x35   : > { %416 = vadd.xlane.f32.xlu0 %v415_v2  ;;  %v419_v5 = vmul.f32 32.0, %v2146_v4  ;;  %vm423_vm2 = vweird.f32 %v2146_v4  ;;  %644 = vmatpush.bf16.msra.mxu2 %v1722_v34  ;;  %v1774_v45 = vor.u32 %v2024_v42, %v1773_v41  ;;  %v2020_v47 = vld [vmem:[%s2398_s29 + $0x7c] sm:$0xf]  ;;  %v1791_v48 = vld [vmem:[%s2398_s29 + $0xa8] sm:$0xf0]  ;;  %v1782_v49 = vor.u32 %v2025_v46, %v1781_v43 }
  0x36   : > { %670 = vmatpush.bf16.msra.mxu3 %v1730_v35  ;;  %696 = vmatpush.bf16.msra.mxu1 %v1738_v38  ;;  %v1794_v50 = vor.u32 %v2020_v47, %v1791_v48  ;;  %v2021_v51 = vld [vmem:[%s2398_s29 + $0x84] sm:$0xf]  ;;  %v1799_v52 = vld [vmem:[%s2398_s29 + $0xb0] sm:$0xf0]  ;;  %v1725_v53 = vld [vmem:[%s2398_s29 + $0x8] sm:$0xf] }
  0x37   : > { %v420_v6 = vsub.f32 1.0, %v419_v5  ;;  %v1802_v55 = vor.u32 %v2021_v51, %v1799_v52  ;;  %v2012_v56 = vld [vmem:[%s2398_s29 + $0x34] sm:$0xf0]  ;;  %v1733_v57 = vld [vmem:[%s2398_s29 + $0x10] sm:$0xf] }
  0x38   : > { %682 = vmatpush.bf16.msrb.mxu0 %v1782_v49  ;;  %v1726_v58 = vor.u32 %v2012_v56, %v1725_v53  ;;  %v2013_v59 = vld [vmem:[%s2398_s29 + $0x3c] sm:$0xf0]  ;;  %v2008_v60 = vld [vmem:[%s2398_s29 + $0x1c] sm:$0xf]  ;;  %v1743_v61 = vld [vmem:[%s2398_s29 + $0x48] sm:$0xf0] }
  0x39   : > { %v421_v7 = vmul.f32 %v2146_v4, %v420_v6  ;;  %656 = vmatpush.bf16.msrb.mxu2 %v1774_v45  ;;  %v1734_v62 = vor.u32 %v2013_v59, %v1733_v57  ;;  %v1746_v63 = vor.u32 %v2008_v60, %v1743_v61  ;;  %v2009_v0 = vld [vmem:[%s2398_s29 + $0x24] sm:$0xf]  ;;  %v1751_v2 = vld [vmem:[%s2398_s29 + $0x50] sm:$0xf0]  ;;  %v1789_v18 = vld [vmem:[%s2398_s29 + $0x78] sm:$0xf] }
  0x3a   : > { %721 = vmatpush.bf16.msrb.mxu3 %v1794_v50  ;;  %747 = vmatpush.bf16.msrb.mxu1 %v1802_v55  ;;  %v1754_v3 = vor.u32 %v2009_v0, %v1751_v2  ;;  %v2026_v19 = vld [vmem:[%s2398_s29 + $0xa4] sm:$0xf0]  ;;  %v1797_v20 = vld [vmem:[%s2398_s29 + $0x80] sm:$0xf]  ;;  %v2027_v21 = vld [vmem:[%s2398_s29 + $0xac] sm:$0xf0] }
  0x3b   : > { %v422_v8 = vadd.f32 %v2146_v4, %v421_v7  ;;  %v2022_v23 = vld [vmem:[%s2398_s29 + $0x8c] sm:$0xf]  ;;  %v1807_v24 = vld [vmem:[%s2398_s29 + $0xb8] sm:$0xf0]  ;;  %v1790_v26 = vor.u32 %v2026_v19, %v1789_v18  ;;  %v1798_v27 = vor.u32 %v2027_v21, %v1797_v20  ;;  %v1741_v28 = vld [vmem:[%s2398_s29 + $0x18] sm:$0xf] }
  0x3c   : > { %683 = vmatpush.bf16.msrb.mxu0 %v1734_v62  ;;  %v1810_v29 = vor.u32 %v2022_v23, %v1807_v24  ;;  %v2014_v30 = vld [vmem:[%s2398_s29 + $0x44] sm:$0xf0]  ;;  %v1749_v31 = vld [vmem:[%s2398_s29 + $0x20] sm:$0xf]  ;;  %v2015_v32 = vld [vmem:[%s2398_s29 + $0x4c] sm:$0xf0] }
  0x3d   : > { %v2434_v9 = vsel %vm423_vm2, %v2146_v4, %v422_v8  ;;  %657 = vmatpush.bf16.msrb.mxu2 %v1726_v58  ;;  %v2480_v8 = vld [vmem:[%s2423_s17] sm:$0xff]  ;;  %v1759_v33 = vld [vmem:[%s2398_s29 + $0x58] sm:$0xf0]  ;;  %v1742_v34 = vor.u32 %v2014_v30, %v1741_v28  ;;  %v1750_v35 = vor.u32 %v2015_v32, %v1749_v31  ;;  %v1805_v37 = vld [vmem:[%s2398_s29 + $0x88] sm:$0xf] }
  0x3e   : > { %722 = vmatpush.bf16.msrb.mxu3 %v1746_v63  ;;  %748 = vmatpush.bf16.msrb.mxu1 %v1754_v3  ;;  %v446_v15 = vperm.slane %v2480_v8, 1  ;;  %v2028_v38 = vld [vmem:[%s2398_s29 + $0xb4] sm:$0xf0]  ;;  %v1757_v41 = vld [vmem:[%s2398_s29 + $0x28] sm:$0xf]  ;;  %v2516_v50 = vld [vmem:[%s2408_s20] sm:$0xff] }
  0x3f   : > { %v2016_v42 = vld [vmem:[%s2398_s29 + $0x54] sm:$0xf0]  ;;  %v482_v51 = vperm.slane %v2516_v50, 5  ;;  %v481_v52 = vperm.slane %v2516_v50, 4  ;;  %v478_v63 = vperm.slane %v2516_v50, 1  ;;  %v477_v3 = vperm.slane %v2516_v50, 0 }
  0x40   : > { %v1758_v43 = vor.u32 %v2016_v42, %v1757_v41  ;;  %v484_v20 = vperm.slane %v2516_v50, 7 }
  0xa8   : > { %v417_v10 = vpop.xlane.xlu0 %416 }
  0xa9   : > { %v425_v11 = vmul.f32 %v2434_v9, %v417_v10 }
  0xab   : > { %v2438_v12 = vsub.f32 %v2430_v1, %v425_v11 }
  0xad   : > { %v427_v13 = vmul.f32 %v2438_v12, %v2438_v12 }
  0xaf   : > { %v428_v14 = vsel %vm414_vm1, %v427_v13, 0.0  ;;  %v444_v13 = vperm.slane %v2480_v8, 0 }
  0xb0   : > { %429 = vadd.xlane.f32.xlu0 %v428_v14 }
 0x123   : > { %v430_v40 = vpop.xlane.xlu0 %429 }
 0x124   : > { %v431_v44 = vmul.f32 %v430_v40, %v2434_v9  ;;  %v1806_v40 = vor.u32 %v2028_v38, %v1805_v37  ;;  %v480_v38 = vperm.slane %v2516_v50, 3 }
 0x126   : > { %v432_v54 = vadd.f32 1e-05, %v431_v44 }
 0x128   : > { %2147 = vrsqrt.f32 %v432_v54  ;;  %vm439_vm4 = vweird.f32 %v432_v54 }
 0x12e   : > { %v2148_v4 = vpop.eup %2147 }
 0x12f   : > { %v434_v5 = vmul.f32 %v2148_v4, %v432_v54  ;;  %vm440_vm3 = vweird.f32 %v2148_v4 }
 0x130   : > { %vm441_vm5 = vmor %vm439_vm4, %vm440_vm3 }
 0x131   : > { %v435_v6 = vmul.f32 %v2148_v4, %v434_v5 }
 0x133   : > { %v436_v7 = vmul.f32 0.5, %v435_v6 }
 0x135   : > { %v437_v10 = vsub.f32 1.5, %v436_v7 }
 0x137   : > { %v438_v11 = vmul.f32 %v2148_v4, %v437_v10 }
 0x139   : > { %v442_v14 = vsel %vm441_vm5, %v2148_v4, %v438_v11  ;;  %v474_v4 = vld [vmem:[%s2408_s20 + $0x8] sm:$0xf] }
 0x13a   : > { %v443_v16 = vmul.f32 %v442_v14, %v2438_v12  ;;  %v2010_v12 = vld [vmem:[%s2398_s29 + $0x2c] sm:$0xf]  ;;  %v486_v7 = vperm.slane %v474_v4, 1  ;;  %v485_v10 = vperm.slane %v474_v4, 0  ;;  %v488_v42 = vperm.slane %v474_v4, 3 }
 0x13b   : > { %v1762_v36 = vor.u32 %v2010_v12, %v1759_v33  ;;  %v479_v33 = vperm.slane %v2516_v50, 2 }
 0x13c   : > { %v445_v17 = vmul.f32 %v444_v13, %v443_v16 }
 0x13e   : > { %v447_v22 = vadd.f32 %v446_v15, %v445_v17 }
 0x140   : > { %v448_v25 = vpack.c.bf16 %v447_v22, %v447_v22  ;;  %v483_v22 = vperm.slane %v2516_v50, 6 }
 0x142   : > { %1811 = vmatmul.msk.bf16.vlgmr.msra.gmra.mxu0 %vm414_vm1, %v448_v25  ;;  %1812 = vmatmul.msk.bf16.vlgmr.msra.gmra.mxu2 %vm414_vm1, %v448_v25 }
 0x143   : > { %1814 = vmatmul.msk.bf16.vlgmr.msra.gmra.mxu3 %vm414_vm1, %v448_v25  ;;  %1816 = vmatmul.msk.bf16.vlgmr.msra.gmra.mxu1 %vm414_vm1, %v448_v25 }
 0x144   : > { %708 = vmatpush.bf16.msra.mxu2 %v1790_v26  ;;  %734 = vmatpush.bf16.msra.mxu0 %v1798_v27 }
 0x145   : > { %773 = vmatpush.bf16.msra.mxu3 %v1810_v29 }
 0x148   : > { %709 = vmatpush.bf16.msra.mxu2 %v1742_v34  ;;  %735 = vmatpush.bf16.msra.mxu0 %v1750_v35 }
 0x149   : > { %774 = vmatpush.bf16.msra.mxu3 %v1762_v36 }
 0x152   : > { %1813 = vmatmul.msk.bf16.vlgmr.msrb.gmra.mxu2 %vm414_vm1, %v448_v25  ;;  %1815 = vmatmul.msk.bf16.vlgmr.msrb.gmra.mxu0 %vm414_vm1, %v448_v25 }
 0x153   : > { %1818 = vmatmul.msk.bf16.vlgmr.msrb.gmra.mxu3 %vm414_vm1, %v448_v25  ;;  %1820 = vmatmul.msk.bf16.vlgmr.msrb.gmra.mxu1 %vm414_vm1, %v448_v25 }
 0x154   : > { %760 = vmatpush.bf16.msrb.mxu2 %v1806_v40 }
 0x158   : > { %761 = vmatpush.bf16.msrb.mxu2 %v1758_v43  ;;  %v487_v43 = vperm.slane %v474_v4, 2 }
 0x162   : > { %1817 = vmatmul.msk.bf16.vlgmr.msra.gmra.mxu2 %vm414_vm1, %v448_v25  ;;  %1819 = vmatmul.msk.bf16.vlgmr.msra.gmra.mxu0 %vm414_vm1, %v448_v25 }
 0x163   : > { %1822 = vmatmul.msk.bf16.vlgmr.msra.gmra.mxu3 %vm414_vm1, %v448_v25 }
 0x172   : > { %1821 = vmatmul.msk.bf16.vlgmr.msrb.gmra.mxu2 %vm414_vm1, %v448_v25 }
 0x1bf   : > { %v633_v44 = vpop.f32.mrf.mxu0 }
 0x1c0   : > { %v698_v45 = vpop.f32.mrf.mxu1  ;;  %v634_v11 = vadd.f32 %v633_v44, %v477_v3 }
 0x1c1   : > { %v699_v56 = vadd.f32 %v698_v45, %v482_v51 }
 0x1c5   : > { %v646_v46 = vpop.f32.mrf.mxu2 }
 0x1c6   : > { %v2513_v47 = vpop.f32.mrf.mxu3  ;;  %v647_v5 = vadd.f32 %v646_v46, %v478_v63 }
 0x1c7   : > { %v635_v48 = vpop.f32.mrf.mxu0  ;;  %v673_v44 = vadd.f32 %v2513_v47, %v480_v38 }
 0x1c8   : > { %v700_v49 = vpop.f32.mrf.mxu1  ;;  %v780_v16 = vpack.c.bf16 %v647_v5, %v634_v11 }
 0x1ca   : > { %v787_v23 = vrot.slane %v780_v16, 4 }
 0x1cd   : > { %v648_v53 = vpop.f32.mrf.mxu2 }
 0x1ce   : > { %v674_v54 = vpop.f32.mrf.mxu3 }
 0x1cf   : > { %v685_v55 = vpop.f32.mrf.mxu0 }
 0x1d0   : > { %v686_v57 = vadd.f32 %v685_v55, %v481_v52  ;;  %v750_v58 = vpop.f32.mrf.mxu1 }
 0x1d1   : > { %v751_v18 = vadd.f32 %v750_v58, %v486_v7  ;;  %v812_v58 = vlaneseq }
 0x1d2   : > { %v782_v59 = vpack.c.bf16 %v699_v56, %v686_v57 }
 0x1d4   : > { %v793_v60 = vrot.slane %v782_v59, 4  ;;  %798 = vst [vmem:[#allocation2] sm:$0xf] %v782_v59  ;;  %v813_v59 = vshrl.u32 %v812_v58, 7 }
 0x1d5   : > { %v659_v61 = vpop.f32.mrf.mxu2 }
 0x1d6   : > { %799 = vst [vmem:[#allocation2 + $0x4] sm:$0xf] %v793_v60  ;;  %v724_v62 = vpop.f32.mrf.mxu3  ;;  %v660_v40 = vadd.f32 %v659_v61, %v479_v33  ;;  %v875_v60 = vand.u32 127, %v812_v58  ;;  %v2051_v58 = vld [vmem:[%s2403_s18 + $0xb0] sm:$0xff] }
 0x1d7   : > { %v687_v0 = vpop.f32.mrf.mxu0  ;;  %v725_v26 = vadd.f32 %v724_v62, %v484_v20 }
 0x1d8   : > { %v752_v2 = vpop.f32.mrf.mxu1  ;;  %v781_v46 = vpack.c.bf16 %v673_v44, %v660_v40  ;;  %vm876_vm7 = vcmp.ge.s32.totalorder %v813_v59, %v875_v60  ;;  %v2042_v59 = vld [vmem:[%s2403_s18 + $0x68] sm:$0xff] }
 0x1d9   : > { %v2050_v60 = vld [vmem:[%s2403_s18 + $0xa8] sm:$0xff] }
 0x1da   : > { %v790_v53 = vrot.slane %v781_v46, 4 }
 0x1db   : > { %v814_v6 = vld [vmem:[#allocation2] sm:$0xf] }
 0x1dc   : > { %829 = vmatpush.bf16.xpose.msrb.mxu0 %v814_v6 }
 0x1dd   : > { %v661_v13 = vpop.f32.mrf.mxu2  ;;  %v815_v14 = vld [vmem:[#allocation2 + $0x4] sm:$0xf] }
 0x1de   : > { %v726_v15 = vpop.f32.mrf.mxu3  ;;  %842 = vmatpush.bf16.xpose.msra.mxu1 %v815_v14 }
 0x1df   : > { %v737_v17 = vpop.f32.mrf.mxu0 }
 0x1e0   : > { %v738_v19 = vadd.f32 %v737_v17, %v485_v10 }
 0x1e2   : > { %v784_v21 = vpack.c.bf16 %v751_v18, %v738_v19 }
 0x1e3   : > { %830 = vmatmul.bf16.vlgmr.msrb.gmra.mxu0 %v780_v16 }
 0x1e4   : > { %v803_v24 = vrot.slane %v784_v21, 4  ;;  %808 = vst [vmem:[#allocation3] sm:$0xf] %v784_v21 }
 0x1e5   : > { %v711_v25 = vpop.f32.mrf.mxu2  ;;  %843 = vmatmul.bf16.vlgmr.msra.gmra.mxu1 %v787_v23 }
 0x1e6   : > { %809 = vst [vmem:[#allocation3 + $0x4] sm:$0xf] %v803_v24  ;;  %v712_v27 = vadd.f32 %v711_v25, %v483_v22  ;;  %v776_v28 = vpop.f32.mrf.mxu3 }
 0x1e7   : > { %v739_v29 = vpop.f32.mrf.mxu0  ;;  %v777_v49 = vadd.f32 %v776_v28, %v488_v42  ;;  %v2036_v28 = vld [vmem:[%s2403_s18 + $0x38] sm:$0xff] }
 0x1e8   : > { %v783_v30 = vpack.c.bf16 %v725_v26, %v712_v27 }
 0x1ea   : > { %v796_v31 = vrot.slane %v783_v30, 4  ;;  %800 = vst [vmem:[#allocation2 + $0x8] sm:$0xf] %v783_v30 }
 0x1eb   : > { %v818_v32 = vld [vmem:[#allocation3] sm:$0xf] }
 0x1ec   : > { %801 = vst [vmem:[#allocation2 + $0xc] sm:$0xf] %v796_v31  ;;  %v953_v12 = vsel %vm951_vm6, %v818_v32, 0  ;;  %v2035_v31 = vld [vmem:[%s2403_s18 + $0x30] sm:$0xff]  ;;  %v2034_v32 = vld [vmem:[%s2403_s18 + $0x28] sm:$0xff] }
 0x1ed   : > { %v713_v34 = vpop.f32.mrf.mxu2  ;;  %962 = vmatpush.bf16.msra.mxu0 %v953_v12  ;;  %v819_v35 = vld [vmem:[#allocation3 + $0x4] sm:$0xf] }
 0x1ee   : > { %v778_v36 = vpop.f32.mrf.mxu3  ;;  %v972_v37 = vsel %vm951_vm6, %v819_v35, 0  ;;  %v2033_v35 = vld [vmem:[%s2403_s18 + $0x20] sm:$0xff] }
 0x1ef   : > { %981 = vmatpush.bf16.msrb.mxu1 %v972_v37 }
 0x1f1   : > { %v816_v41 = vld [vmem:[#allocation2 + $0x8] sm:$0xf]  ;;  %1153 = vmatpush.bf16.msrb.mxu0 %v2036_v28 }
 0x1f2   : > { %855 = vmatpush.bf16.xpose.msra.mxu2 %v816_v41 }
 0x1f3   : > { %v817_v45 = vld [vmem:[#allocation2 + $0xc] sm:$0xf] }
 0x1f4   : > { %868 = vmatpush.bf16.xpose.msrb.mxu3 %v817_v45 }
 0x1f5   : > { %v763_v48 = vpop.f32.mrf.mxu2  ;;  %1154 = vmatpush.bf16.msrb.mxu0 %v2035_v31 }
 0x1f6   : > { %v764_v51 = vadd.f32 %v763_v48, %v487_v43 }
 0x1f8   : > { %v785_v52 = vpack.c.bf16 %v777_v49, %v764_v51  ;;  %v2032_v51 = vld [vmem:[%s2403_s18 + $0x18] sm:$0xff] }
 0x1f9   : > { %856 = vmatmul.bf16.vlgmr.msra.gmra.mxu2 %v781_v46  ;;  %1155 = vmatpush.bf16.msrb.mxu0 %v2034_v32  ;;  %v2054_v32 = vld [vmem:[%s2403_s18 + $0xc8] sm:$0xff] }
 0x1fa   : > { %v806_v54 = vrot.slane %v785_v52, 4  ;;  %810 = vst [vmem:[#allocation3 + $0x8] sm:$0xf] %v785_v52  ;;  %v2031_v52 = vld [vmem:[%s2403_s18 + $0x10] sm:$0xff] }
 0x1fb   : > { %869 = vmatmul.bf16.vlgmr.msrb.gmra.mxu3 %v790_v53  ;;  %v2030_v53 = vld [vmem:[%s2403_s18 + $0x8] sm:$0xff] }
 0x1fc   : > { %811 = vst [vmem:[#allocation3 + $0xc] sm:$0xf] %v806_v54  ;;  %v2029_v54 = vld [vmem:[%s2403_s18] sm:$0xff] }
 0x1fd   : > { %v765_v50 = vpop.f32.mrf.mxu2  ;;  %1156 = vmatpush.bf16.msrb.mxu0 %v2033_v35 }
 0x201   : > { %v820_v55 = vld [vmem:[#allocation3 + $0x8] sm:$0xf]  ;;  %1157 = vmatpush.bf16.msrb.mxu0 %v2032_v51 }
 0x202   : > { %v991_v56 = vsel %vm951_vm6, %v820_v55, 0  ;;  %v2044_v55 = vld [vmem:[%s2403_s18 + $0x78] sm:$0xff] }
 0x203   : > { %1000 = vmatpush.bf16.msrb.mxu2 %v991_v56  ;;  %v821_v57 = vld [vmem:[#allocation3 + $0xc] sm:$0xf]  ;;  %1214 = vmatpush.bf16.msra.mxu1 %v2044_v55 }
 0x204   : > { %v1010_v47 = vsel %vm951_vm6, %v821_v57, 0  ;;  %v2052_v56 = vld [vmem:[%s2403_s18 + $0xb8] sm:$0xff] }
 0x205   : > { %1019 = vmatpush.bf16.msra.mxu3 %v1010_v47  ;;  %1158 = vmatpush.bf16.msrb.mxu0 %v2031_v52  ;;  %v2043_v47 = vld [vmem:[%s2403_s18 + $0x70] sm:$0xff] }
 0x207   : > { %1275 = vmatpush.bf16.msra.mxu2 %v2052_v56  ;;  %1215 = vmatpush.bf16.msra.mxu1 %v2043_v47 }
 0x209   : > { %1159 = vmatpush.bf16.msrb.mxu0 %v2030_v53 }
 0x20b   : > { %1276 = vmatpush.bf16.msra.mxu2 %v2051_v58  ;;  %1216 = vmatpush.bf16.msra.mxu1 %v2042_v59 }
 0x20d   : > { %1160 = vmatpush.bf16.msrb.mxu0 %v2029_v54 }
 0x20f   : > { %1277 = vmatpush.bf16.msra.mxu2 %v2050_v60 }
 0x260   : > { %v831_v61 = vpop.f32.mrf.mxu0 }
 0x261   : > { %v879_v62 = vsel %vm876_vm7, %v831_v61, -1e+30  ;;  %v2060_v61 = vld [vmem:[%s2403_s18 + $0xf8] sm:$0xff] }
 0x262   : > { %v844_v63 = vpop.f32.mrf.mxu1  ;;  %v884_v0 = vsel %vm883_vm8, %v879_v62, -inf  ;;  %1336 = vmatpush.bf16.msrb.mxu3 %v2060_v61 }
 0x263   : > { %885 = vmax.xlane.f32.xlu2 %v884_v0  ;;  %v880_v2 = vsel %vm876_vm7, %v844_v63, -1e+30  ;;  %v2049_v0 = vld [vmem:[%s2403_s18 + $0xa0] sm:$0xff] }
 0x264   : > { %v887_v5 = vsel %vm883_vm8, %v880_v2, -inf  ;;  %1278 = vmatpush.bf16.msra.mxu2 %v2049_v0 }
 0x268   : > { %v833_v3 = vpop.f32.mrf.mxu0 }
 0x269   : > { %v2040_v3 = vld [vmem:[%s2403_s18 + $0x58] sm:$0xff] }
 0x26a   : > { %v846_v4 = vpop.f32.mrf.mxu1 }
 0x26b   : > { %888 = vmax.xlane.f32.xlu2 %v887_v5 }
 0x27c   : > { %v857_v6 = vpop.f32.mrf.mxu2 }
 0x27d   : > { %v881_v7 = vsel %vm876_vm7, %v857_v6, -1e+30 }
 0x27e   : > { %v870_v10 = vpop.f32.mrf.mxu3  ;;  %v890_v11 = vsel %vm883_vm8, %v881_v7, -inf }
 0x27f   : > { %891 = vmax.xlane.f32.xlu1 %v890_v11  ;;  %v882_v13 = vsel %vm876_vm7, %v870_v10, -1e+30  ;;  %v2058_v10 = vld [vmem:[%s2403_s18 + $0xe8] sm:$0xff]  ;;  %v2039_v11 = vld [vmem:[%s2403_s18 + $0x50] sm:$0xff] }
 0x280   : > { %v893_v16 = vsel %vm883_vm8, %v882_v13, -inf }
 0x284   : > { %v859_v14 = vpop.f32.mrf.mxu2 }
 0x285   : > { %v2057_v14 = vld [vmem:[%s2403_s18 + $0xe0] sm:$0xff] }
 0x286   : > { %v872_v15 = vpop.f32.mrf.mxu3 }
 0x287   : > { %894 = vmax.xlane.f32.xlu1 %v893_v16  ;;  %v2038_v15 = vld [vmem:[%s2403_s18 + $0x48] sm:$0xff] }
 0x2d6   : > { %v886_v17 = vpop.xlane.xlu2 %885 }
 0x2d7   : > { %v896_v18 = vmax.f32 %v886_v17, -1e+30 }
 0x2d9   : > { %v912_v19 = vsub.f32 %v879_v62, %v896_v18  ;;  %v900_v50 = vsub.f32 -1e+30, %v896_v18  ;;  %v2041_v62 = vld [vmem:[%s2403_s18 + $0x60] sm:$0xff]  ;;  %v2046_v18 = vld [vmem:[%s2403_s18 + $0x88] sm:$0xff] }
 0x2da   : > { %1217 = vmatpush.bf16.msra.mxu1 %v2041_v62 }
 0x2db   : > { %v916_v20 = vmul.f32 1.442695, %v912_v19  ;;  %v904_v57 = vmul.f32 1.442695, %v900_v50  ;;  %v2056_v19 = vld [vmem:[%s2403_s18 + $0xd8] sm:$0xff] }
 0x2dd   : > { %2149 = vpow2.f32 %v916_v20 }
 0x2de   : > { %v2540_v21 = vpop.xlane.xlu2 %888  ;;  %1218 = vmatpush.bf16.msra.mxu1 %v2040_v3 }
 0x2df   : > { %v897_v22 = vmax.f32 %v2540_v21, -1e+30 }
 0x2e1   : > { %v913_v23 = vsub.f32 %v880_v2, %v897_v22  ;;  %v2059_v2 = vld [vmem:[%s2403_s18 + $0xf0] sm:$0xff]  ;;  %v901_v28 = vsub.f32 -1e+30, %v897_v22 }
 0x2e2   : > { %1337 = vmatpush.bf16.msrb.mxu3 %v2059_v2  ;;  %1219 = vmatpush.bf16.msra.mxu1 %v2039_v11 }
 0x2e3   : > { %v918_v24 = vmul.f32 1.442695, %v913_v23  ;;  %v2150_v25 = vpop.eup %2149 }
 0x2e4   : > { %v944_v26 = vpack.c.bf16 %v2150_v25, %v2150_v25  ;;  %v928_v27 = vsel %vm883_vm8, %v2150_v25, 0.0 }
 0x2e5   : > { %2151 = vpow2.f32 %v918_v24  ;;  %929 = vadd.xlane.f32.xlu2 %v928_v27  ;;  %v2037_v24 = vld [vmem:[%s2403_s18 + $0x40] sm:$0xff]  ;;  %v2055_v27 = vld [vmem:[%s2403_s18 + $0xd0] sm:$0xff] }
 0x2e6   : > { %1823 = vmatmul.msk.bf16.vlgmr.msra.gmra.mxu0 %vm883_vm8, %v944_v26  ;;  %1338 = vmatpush.bf16.msrb.mxu3 %v2058_v10  ;;  %v2045_v26 = vld [vmem:[%s2403_s18 + $0x80] sm:$0xff] }
 0x2e7   : > { %1220 = vmatpush.bf16.msra.mxu1 %v2038_v15 }
 0x2ea   : > { %1339 = vmatpush.bf16.msrb.mxu3 %v2057_v14 }
 0x2eb   : > { %v2152_v29 = vpop.eup %2151  ;;  %1221 = vmatpush.bf16.msra.mxu1 %v2037_v24 }
 0x2ec   : > { %v945_v30 = vpack.c.bf16 %v2152_v29, %v2152_v29  ;;  %v931_v49 = vsel %vm883_vm8, %v2152_v29, 0.0 }
 0x2ee   : > { %1824 = vmatmul.msk.bf16.vlgmr.msrb.gmra.mxu1 %vm883_vm8, %v945_v30  ;;  %1340 = vmatpush.bf16.msrb.mxu3 %v2056_v19 }
 0x2f2   : > { %v2551_v12 = vpop.xlane.xlu1 %891  ;;  %1341 = vmatpush.bf16.msrb.mxu3 %v2055_v27 }
 0x2f3   : > { %v898_v33 = vmax.f32 %v2551_v12, -1e+30 }
 0x2f5   : > { %v914_v34 = vsub.f32 %v881_v7, %v898_v33  ;;  %v2048_v7 = vld [vmem:[%s2403_s18 + $0x98] sm:$0xff]  ;;  %v902_v29 = vsub.f32 -1e+30, %v898_v33 }
 0x2f6   : > { %1279 = vmatpush.bf16.msra.mxu2 %v2048_v7  ;;  %1342 = vmatpush.bf16.msrb.mxu3 %v2054_v32  ;;  %v2061_v32 = vld [vmem:[%s2413_s0] sm:$0xff] }
 0x2f7   : > { %v920_v36 = vmul.f32 1.442695, %v914_v34  ;;  %v906_v34 = vmul.f32 1.442695, %v901_v28  ;;  %v908_v35 = vmul.f32 1.442695, %v902_v29 }
 0x2f9   : > { %2153 = vpow2.f32 %v920_v36  ;;  %v2053_v36 = vld [vmem:[%s2403_s18 + $0xc0] sm:$0xff] }
 0x2fa   : > { %v2557_v37 = vpop.xlane.xlu1 %894  ;;  %1343 = vmatpush.bf16.msrb.mxu3 %v2053_v36  ;;  %v2069_v36 = vld [vmem:[%s2418_s15 + $0x30] sm:$0xff] }
 0x2fb   : > { %v899_v38 = vmax.f32 %v2557_v37, -1e+30 }
 0x2fd   : > { %v915_v40 = vsub.f32 %v882_v13, %v899_v38  ;;  %v2047_v13 = vld [vmem:[%s2403_s18 + $0x90] sm:$0xff] }
 0x2fe   : > { %1280 = vmatpush.bf16.msra.mxu2 %v2047_v13 }
 0x2ff   : > { %v922_v41 = vmul.f32 1.442695, %v915_v40  ;;  %v2154_v42 = vpop.eup %2153  ;;  %v903_v40 = vsub.f32 -1e+30, %v899_v38 }
 0x300   : > { %v946_v43 = vpack.c.bf16 %v2154_v42, %v2154_v42  ;;  %v934_v44 = vsel %vm883_vm8, %v2154_v42, 0.0 }
 0x301   : > { %2155 = vpow2.f32 %v922_v41  ;;  %935 = vadd.xlane.f32.xlu0 %v934_v44  ;;  %v910_v12 = vmul.f32 1.442695, %v903_v40 }
 0x302   : > { %1825 = vmatmul.msk.bf16.vlgmr.msrb.gmra.mxu2 %vm883_vm8, %v946_v43  ;;  %2157 = vpow2.f32 %v904_v57 }
 0x303   : > { %1281 = vmatpush.bf16.msra.mxu2 %v2046_v18 }
 0x307   : > { %v2156_v45 = vpop.eup %2155  ;;  %1282 = vmatpush.bf16.msra.mxu2 %v2045_v26 }
 0x308   : > { %v947_v46 = vpack.c.bf16 %v2156_v45, %v2156_v45  ;;  %v937_v48 = vsel %vm883_vm8, %v2156_v45, 0.0  ;;  %v2158_v63 = vpop.eup %2157 }
 0x309   : > { %938 = vadd.xlane.f32.xlu1 %v937_v48  ;;  %932 = vadd.xlane.f32.xlu0 %v931_v49  ;;  %v924_v5 = vmul.f32 0.0, %v2158_v63 }
 0x30a   : > { %1826 = vmatmul.msk.bf16.vlgmr.msra.gmra.mxu3 %vm883_vm8, %v947_v46 }
 0x358   : > { %v930_v4 = vpop.xlane.xlu2 %929 }
 0x359   : > { %v940_v6 = vadd.f32 %v930_v4, %v924_v5 }
 0x35b   : > { %2159 = vrcp.f32 %v940_v6 }
 0x35c   : > { %2161 = vpow2.f32 %v906_v34 }
 0x35d   : > { %2163 = vpow2.f32 %v908_v35 }
 0x35e   : > { %2165 = vpow2.f32 %v910_v12 }
 0x361   : > { %v2160_v20 = vpop.eup %2159 }
 0x362   : > { %v2162_v33 = vpop.eup %2161 }
 0x363   : > { %v964_v16 = vpop.f32.mrf.mxu0  ;;  %v2164_v41 = vpop.eup %2163  ;;  %v925_v42 = vmul.f32 0.0, %v2162_v33 }
 0x364   : > { %v1025_v17 = vadd.f32 %v964_v16, %v924_v5  ;;  %v926_v43 = vmul.f32 0.0, %v2164_v41  ;;  %v2166_v48 = vpop.eup %2165 }
 0x365   : > { %v927_v51 = vmul.f32 0.0, %v2166_v48 }
 0x366   : > { %v1033_v23 = vmul.f32 %v2160_v20, %v1025_v17  ;;  %v1356_v17 = vperm.slane %v2480_v8, 4 }
 0x368   : > { %v1037_v25 = vpack.c.bf16 %v1033_v23, %v1033_v23 }
 0x36a   : > { %1161 = vmatmul.bf16.vlgmr.msrb.gmra.mxu0 %v1037_v25 }
 0x36b   : > { %v966_v30 = vpop.f32.mrf.mxu0  ;;  %v983_v31 = vpop.f32.mrf.mxu1 }
 0x36c   : > { %v1026_v52 = vadd.f32 %v983_v31, %v925_v42  ;;  %v2062_v31 = vld [vmem:[%s2413_s0 + $0x8] sm:$0xff] }
 0x36d   : > { %1412 = vmatpush.bf16.msra.mxu0 %v2062_v31 }
 0x371   : > { %1413 = vmatpush.bf16.msra.mxu0 %v2061_v32 }
 0x373   : > { %v985_v21 = vpop.f32.mrf.mxu1 }
 0x374   : > { %v936_v22 = vpop.xlane.xlu0 %935 }
 0x375   : > { %v942_v45 = vadd.f32 %v936_v22, %v926_v43 }
 0x37c   : > { %v933_v44 = vpop.xlane.xlu0 %932  ;;  %v939_v49 = vpop.xlane.xlu1 %938 }
 0x37d   : > { %v941_v46 = vadd.f32 %v933_v44, %v925_v42  ;;  %v943_v37 = vadd.f32 %v939_v49, %v927_v51 }
 0x37f   : > { %2167 = vrcp.f32 %v941_v46  ;;  %v1383_v46 = vperm.slane %v2480_v8, 3 }
 0x380   : > { %2169 = vrcp.f32 %v942_v45 }
 0x381   : > { %2171 = vrcp.f32 %v943_v37  ;;  %v2067_v37 = vld [vmem:[%s2418_s15 + $0x20] sm:$0xff] }
 0x385   : > { %v1002_v38 = vpop.f32.mrf.mxu2  ;;  %v2168_v53 = vpop.eup %2167 }
 0x386   : > { %v1027_v54 = vadd.f32 %v1002_v38, %v926_v43  ;;  %v2170_v50 = vpop.eup %2169  ;;  %v1034_v55 = vmul.f32 %v2168_v53, %v1026_v52  ;;  %v1381_v43 = vperm.slane %v2480_v8, 2  ;;  %v2068_v52 = vld [vmem:[%s2418_s15 + $0x28] sm:$0xff]  ;;  %v2066_v38 = vld [vmem:[%s2418_s15 + $0x18] sm:$0xff]  ;;  %v2065_v53 = vld [vmem:[%s2418_s15 + $0x10] sm:$0xff] }
 0x387   : > { %v2172_v61 = vpop.eup %2171 }
 0x388   : > { %v1035_v56 = vmul.f32 %v2170_v50, %v1027_v54  ;;  %v1038_v57 = vpack.c.bf16 %v1034_v55, %v1034_v55  ;;  %v2064_v54 = vld [vmem:[%s2418_s15 + $0x8] sm:$0xff]  ;;  %v2063_v50 = vld [vmem:[%s2418_s15] sm:$0xff]  ;;  %v1390_v55 = vperm.slane %v2480_v8, 6 }
 0x38a   : > { %v1039_v47 = vpack.c.bf16 %v1035_v56, %v1035_v56  ;;  %1222 = vmatmul.bf16.vlgmr.msra.gmra.mxu1 %v1038_v57 }
 0x38c   : > { %1283 = vmatmul.bf16.vlgmr.msra.gmra.mxu2 %v1039_v47 }
 0x38d   : > { %v1004_v58 = vpop.f32.mrf.mxu2  ;;  %v1021_v59 = vpop.f32.mrf.mxu3 }
 0x38e   : > { %v1028_v60 = vadd.f32 %v1021_v59, %v927_v51 }
 0x390   : > { %v1036_v62 = vmul.f32 %v2172_v61, %v1028_v60 }
 0x392   : > { %v1040_v63 = vpack.c.bf16 %v1036_v62, %v1036_v62 }
 0x394   : > { %1344 = vmatmul.bf16.vlgmr.msrb.gmra.mxu3 %v1040_v63 }
 0x395   : > { %v1023_v0 = vpop.f32.mrf.mxu3 }
 0x3e7   : > { %v1162_v2 = vpop.f32.mrf.mxu0 }
 0x3e8   : > { %v1349_v10 = vsel %vm414_vm1, %v1162_v2, 0.0 }
 0x3ef   : > { %v1164_v3 = vpop.f32.mrf.mxu0 }
 0x407   : > { %v1223_v4 = vpop.f32.mrf.mxu1 }
 0x408   : > { %v1350_v7 = vsel %vm414_vm1, %v1223_v4, 0.0 }
 0x409   : > { %v1351_v13 = vadd.f32 %v1350_v7, %v1349_v10 }
 0x40f   : > { %v1284_v5 = vpop.f32.mrf.mxu2  ;;  %v1225_v6 = vpop.f32.mrf.mxu1 }
 0x410   : > { %v1352_v11 = vsel %vm414_vm1, %v1284_v5, 0.0  ;;  %v1445_v5 = vperm.slane %v2480_v8, 5 }
 0x411   : > { %v1353_v14 = vadd.f32 %v1352_v11, %v1351_v13 }
 0x417   : > { %v1286_v15 = vpop.f32.mrf.mxu2  ;;  %v1345_v16 = vpop.f32.mrf.mxu3 }
 0x418   : > { %v1354_v18 = vsel %vm414_vm1, %v1345_v16, 0.0 }
 0x419   : > { %v1355_v19 = vadd.f32 %v1354_v18, %v1353_v14 }
 0x41b   : > { %v1357_v20 = vadd.f32 %v1356_v17, %v1355_v19 }
 0x41d   : > { %v2607_v23 = vadd.f32 %v1357_v20, %v2430_v1  ;;  %v2070_v1 = vld [vmem:[%s2418_s15 + $0x38] sm:$0xff] }
 0x41e   : > { %1494 = vmatpush.bf16.msrb.mxu1 %v2070_v1 }
 0x41f   : > { %v1347_v24 = vpop.f32.mrf.mxu3  ;;  %v1359_v25 = vsel %vm414_vm1, %v2607_v23, 0.0 }
 0x420   : > { %1360 = vadd.xlane.f32.xlu1 %v1359_v25 }
 0x422   : > { %1495 = vmatpush.bf16.msrb.mxu1 %v2069_v36 }
 0x426   : > { %1496 = vmatpush.bf16.msrb.mxu1 %v2068_v52 }
 0x42a   : > { %1497 = vmatpush.bf16.msrb.mxu1 %v2067_v37 }
 0x42e   : > { %1498 = vmatpush.bf16.msrb.mxu1 %v2066_v38 }
 0x432   : > { %1499 = vmatpush.bf16.msrb.mxu1 %v2065_v53 }
 0x436   : > { %1500 = vmatpush.bf16.msrb.mxu1 %v2064_v54 }
 0x43a   : > { %1501 = vmatpush.bf16.msrb.mxu1 %v2063_v50 }
 0x493   : > { %v1361_v26 = vpop.xlane.xlu1 %1360 }
 0x494   : > { %v1362_v27 = vmul.f32 %v1361_v26, %v2434_v9 }
 0x496   : > { %v1363_v28 = vsub.f32 %v2607_v23, %v1362_v27 }
 0x498   : > { %v1364_v29 = vmul.f32 %v1363_v28, %v1363_v28 }
 0x49a   : > { %v1365_v30 = vsel %vm414_vm1, %v1364_v29, 0.0 }
 0x49b   : > { %1366 = vadd.xlane.f32.xlu2 %v1365_v30 }
 0x50e   : > { %v1367_v34 = vpop.xlane.xlu2 %1366 }
 0x50f   : > { %v1368_v35 = vmul.f32 %v1367_v34, %v2434_v9 }
 0x511   : > { %v1369_v40 = vadd.f32 1e-05, %v1368_v35 }
 0x513   : > { %2173 = vrsqrt.f32 %v1369_v40  ;;  %vm1376_vm10 = vweird.f32 %v1369_v40 }
 0x519   : > { %v2174_v21 = vpop.eup %2173 }
 0x51a   : > { %v1371_v22 = vmul.f32 %v2174_v21, %v1369_v40  ;;  %vm1377_vm9 = vweird.f32 %v2174_v21 }
 0x51b   : > { %vm1378_vm11 = vmor %vm1376_vm10, %vm1377_vm9 }
 0x51c   : > { %v1372_v12 = vmul.f32 %v2174_v21, %v1371_v22 }
 0x51e   : > { %v1373_v33 = vmul.f32 0.5, %v1372_v12 }
 0x520   : > { %v1374_v41 = vsub.f32 1.5, %v1373_v33 }
 0x522   : > { %v1375_v42 = vmul.f32 %v2174_v21, %v1374_v41 }
 0x524   : > { %v1379_v44 = vsel %vm1378_vm11, %v2174_v21, %v1375_v42 }
 0x525   : > { %v1380_v45 = vmul.f32 %v1379_v44, %v1363_v28 }
 0x527   : > { %v1382_v48 = vmul.f32 %v1381_v43, %v1380_v45 }
 0x529   : > { %v1384_v49 = vadd.f32 %v1383_v46, %v1382_v48 }
 0x52b   : > { %v1385_v51 = vpack.c.bf16 %v1384_v49, %v1384_v49 }
 0x52d   : > { %1963 = vmatmul.msk.bf16.vlgmr.msra.gmra.mxu0 %vm414_vm1, %v1385_v51 }
 0x5aa   : > { %v1415_v56 = vpop.f32.mrf.mxu0 }
 0x5ab   : > { %v1416_v57 = vadd.f32 %v1415_v56, %v1390_v55 }
 0x5ad   : > { %v1420_v47 = vmul.f32 0.044715, %v1416_v57  ;;  %v1419_v0 = vmul.f32 0.5, %v1416_v57 }
 0x5af   : > { %v1421_v58 = vmul.f32 %v1420_v47, %v1416_v57 }
 0x5b1   : > { %v1422_v59 = vmul.f32 %v1421_v58, %v1416_v57 }
 0x5b2   : > { %v1417_v60 = vpop.f32.mrf.mxu0 }
 0x5b3   : > { %v1423_v61 = vadd.f32 %v1422_v59, %v1416_v57 }
 0x5b5   : > { %v1424_v62 = vmul.f32 0.7978846, %v1423_v61 }
 0x5b7   : > { %2175 = vtanh.f32 %v1424_v62 }
 0x5bd   : > { %v2176_v63 = vpop.eup %2175 }
 0x5be   : > { %v1426_v2 = vadd.f32 1.0, %v2176_v63 }
 0x5c0   : > { %v1427_v3 = vmul.f32 %v1426_v2, %v1419_v0 }
 0x5c2   : > { %v1428_v4 = vpack.c.bf16 %v1427_v3, %v1427_v3 }
 0x5c4   : > { %1502 = vmatmul.bf16.vlgmr.msrb.gmra.mxu1 %v1428_v4 }
 0x641   : > { %v1503_v6 = vpop.f32.mrf.mxu1 }
 0x642   : > { %v1504_v7 = vadd.f32 %v1503_v6, %v1445_v5 }
 0x644   : > { %v1507_v10 = vadd.f32 %v1504_v7, %v2607_v23 }
 0x645   : > { %1512 = sbr.rel (%p1996_p1) target bundleno = 1879 (0x757), region = 56 }
 0x646   : > { %1508 = vst.msk [vmem:[%s2425_s24] sm:$0xff] %vm414_vm1, %v1507_v10 }
 0x649   : > { %v1505_v11 = vpop.f32.mrf.mxu1 }
 0x64a   : > { %v1513_v13 = vsel %vm414_vm1, %v1507_v10, 0.0  ;;  %v1535_v30 = vperm.slane %v2480_v8, 7  ;;  %v1537_v32 = vperm.slane %v2460_v39, 0 }
 0x64b   : > { %1514 = vadd.xlane.f32.xlu0 %v1513_v13 }
 0x6be   : > { %v1515_v14 = vpop.xlane.xlu0 %1514 }
 0x6bf   : > { %v1516_v15 = vmul.f32 %v1515_v14, %v2434_v9 }
 0x6c1   : > { %v1517_v16 = vsub.f32 %v1507_v10, %v1516_v15 }
 0x6c3   : > { %v1518_v17 = vmul.f32 %v1517_v16, %v1517_v16 }
 0x6c5   : > { %v1519_v18 = vsel %vm414_vm1, %v1518_v17, 0.0 }
 0x6c6   : > { %1520 = vadd.xlane.f32.xlu0 %v1519_v18 }
 0x739   : > { %v1521_v19 = vpop.xlane.xlu0 %1520 }
 0x73a   : > { %v1522_v20 = vmul.f32 %v1521_v19, %v2434_v9 }
 0x73c   : > { %v1523_v23 = vadd.f32 1e-05, %v1522_v20 }
 0x73e   : > { %2177 = vrsqrt.f32 %v1523_v23  ;;  %vm1530_vm13 = vweird.f32 %v1523_v23 }
 0x744   : > { %v2178_v24 = vpop.eup %2177 }
 0x745   : > { %v1525_v25 = vmul.f32 %v2178_v24, %v1523_v23  ;;  %vm1531_vm12 = vweird.f32 %v2178_v24 }
 0x746   : > { %vm1532_vm14 = vmor %vm1530_vm13, %vm1531_vm12 }
 0x747   : > { %v1526_v26 = vmul.f32 %v2178_v24, %v1525_v25 }
 0x749   : > { %v1527_v27 = vmul.f32 0.5, %v1526_v26 }
 0x74b   : > { %v1528_v28 = vsub.f32 1.5, %v1527_v27 }
 0x74d   : > { %v1529_v29 = vmul.f32 %v2178_v24, %v1528_v28 }
 0x74f   : > { %v1533_v31 = vsel %vm1532_vm14, %v2178_v24, %v1529_v29 }
 0x750   : > { %v1534_v1 = vmul.f32 %v1533_v31, %v1517_v16 }
 0x752   : > { %v1536_v34 = vmul.f32 %v1535_v30, %v1534_v1 }
 0x754   : > { %v1538_v9 = vadd.f32 %v1537_v32, %v1536_v34 }
 0x756   : > { %1539 = vst.msk [vmem:[%s2425_s24] sm:$0xff] %vm414_vm1, %v1538_v9 }
 0x757 PF: > { %s1998_s0 = sshll.u32 %s2261_s28, 3  ;;  %s1553_s14 = sshll.u32 %s2425_s24, 4  ;;  %s1554_s14 = int_to_ptr.vmem [resolvable:$true] %s1553_s14 }
 0x758   : > { %s1551_s8 = scalar_lea.hbm %s2694_s7, %s1998_s0  ;;  %s2717_s19 = sand.u32 1, %s2249_s25  }
 0x759   : > { %s1555_s18 = sshll.u32 %s1551_s8, 4  ;;  %s1541_s21 = scalar_lea.sflag [#allocation5], %s2717_s19  ;;  %s1556_s18 = int_to_ptr.hbm [resolvable:$true] %s1555_s18 }
 0x75a   : > { %s2193_s10 = sshra.s32 %s1556_s18, 4  ;;  %s2199_s28 = scalar_lea.hbm %s2694_s7, 16  ;;  %s2194_s10 = int_to_ptr.hbm [resolvable:$true] %s2193_s10 }
 0x75b   : > { %s2195_s16 = scalar_lea.hbm %s2194_s10, 8  ;;  %p2200_p6 = scmp.lt.s32.totalorder %s2194_s10, %s2694_s7 }
 0x75c   : > { %p2196_p2 = scmp.ne.s32.totalorder %s2194_s10, %s2195_s16  ;;  %p2201_p7 = scmp.lt.s32.totalorder %s2199_s28, %s2195_s16 }
 0x75e   : > { %p2197_p4 = pnand %p2196_p2, %p2365_p3  ;;  %p2202_p8 = por %p2201_p7, %p2200_p6 }
 0x760   : > { %p2198_p5 = pneg %p2197_p4 }
 0x762   : > { %p2203_p10 = pnand %p2202_p8, %p2198_p5 }
 0x764   : > { %2206 = shalt.err (!%p2203_p10)
}
 0x765   : > { %2073 = dma.vmem_to_hbm [thread:$0]  (%p2365_p3), %s1554_s14, 128, %s1556_s18, %s1541_s21  }
 0x766 PF: > { %s2718_s30 = sld [smem:[#allocation11_spill]] }
 0x767   : > { %s2719_s11 = sld [smem:[#allocation7_spill]] }
 0x76c   : > { %p2079_p11 = scmp.ge.s32.totalorder %s2718_s30, 2 }
 0x76d   : > { %s1567_s26 = sand.u32 1, %s2719_s11  }
 0x76e   : > { %p2076_p12 = pnand %p2079_p11, %p2375_p9  ;;  %s1568_s12 = scalar_lea.sflag [#allocation5], %s1567_s26 }
 0x770   : > { %p2077_p13 = pneg %p2076_p12 }
 0x772   : > { %2240 = dma.done.wait (%p2077_p13), %s1568_s12, 128  }
 0x773   : > { %2242 = vsyncadd (%p2077_p13), %s1568_s12, 4294967168  ;;  %s20_s8 = sadd.s32 1, %s2718_s30   ;;  %s2721_s17 = sld [smem:[#allocation8_spill]] }
 0x774   : > { %p17_p0 = scmp.ge.s32.totalorder %s20_s8, 6   ;;  %s2722_s26 = sld [smem:[#allocation15_spill]] }
 0x775   : > { %s2723_s27 = sld [smem:[#allocation9_spill]]  ;;  %s2727_s24 = smov %s2249_s25 }
 0x776   : > { %s2724_s28 = sld [smem:[#allocation10_spill]]  ;;  %19 = sbr.rel (!%p17_p0) target bundleno = 7 (0x7), region = 109 }
 0x777   : > { %s2725_s29 = sld [smem:[#allocation12_spill]] }
 0x778   : > { %s2726_s30 = sld [smem:[#allocation13_spill]] }
 0x779   : > { %s2728_s25 = smov %s2721_s17 }
 0x77b   :  { %1574 = vsyncpa [#allocation5], 1 }
 0x77c   :  { %1576 = vsyncpa [#allocation5 + $0x1], 1 }

</bundles_post_ra>
